<compile_context>
chip_gen: v7x
topology: tpu7x:2x2x1
jax: 0.10.0
libtpu: 0.0.40
codegen_flags: <defaults>
</compile_context>

<pallas_src>
import functools

import jax
import jax.numpy as jnp
import numpy as np
from jax.experimental import pallas as pl
from jax.experimental.pallas import tpu as pltpu

HEADN = 6
N_EMB = 90                    # node1 = 3 -> 30 * 3
HS = N_EMB // HEADN           # 15
HID = 4 * N_EMB               # 360
LN_EPS = 1e-5

# padded sizes used inside the kernel (lane width = 128)
C_PAD = 128
HID_PAD = 384


def _masked_layernorm(x, gamma, beta, fmask):
    """LayerNorm over the true N_EMB features of a zero-padded (rows, C_PAD) tile."""
    inv_n = 1.0 / N_EMB
    mu = jnp.sum(x * fmask, axis=-1, keepdims=True) * inv_n
    d = (x - mu) * fmask
    var = jnp.sum(d * d, axis=-1, keepdims=True) * inv_n
    return d * jax.lax.rsqrt(var + LN_EPS) * gamma + beta


def block_kernel(x_ref, pvec_ref, bb1_ref, wqkv_ref, wp_ref, w1_ref, w2_ref,
                 o_ref, *, batch_tile, t_pad, t_real):
    rows = batch_tile * t_pad
    x = x_ref[...]                                   # (rows, C_PAD) f32

    # packed per-channel params: rows = [g1, b1, g2, b2, bp, bb2, 0, 0]
    pvec = pvec_ref[...]
    g1, b1 = pvec[0:1], pvec[1:2]
    g2, b2 = pvec[2:3], pvec[3:4]
    bp, bb2 = pvec[4:5], pvec[5:6]

    lane = jax.lax.broadcasted_iota(jnp.int32, (1, C_PAD), 1)
    fmask = (lane < N_EMB).astype(jnp.float32)       # (1, C_PAD)

    # ---- LayerNorm 1 ----
    h = _masked_layernorm(x, g1, b1, fmask)

    # ---- fused QKV projection: one MXU matmul, compact (128, 384) weight ----
    qkv = jnp.dot(h, wqkv_ref[...], preferred_element_type=jnp.float32)  # (rows, 3*C_PAD)
    q3 = qkv[:, 0:C_PAD].reshape(batch_tile, t_pad, C_PAD)
    k3 = qkv[:, C_PAD:2 * C_PAD].reshape(batch_tile, t_pad, C_PAD)
    v3 = qkv[:, 2 * C_PAD:3 * C_PAD].reshape(batch_tile, t_pad, C_PAD)

    # ---- multi-head causal self-attention (batched over the batch dim) ----
    scale = N_EMB ** (-0.5)      # reference Head.forward scales by C**-0.5, C = n_emb
    ri = jax.lax.broadcasted_iota(jnp.int32, (t_pad, t_pad), 0)
    ci = jax.lax.broadcasted_iota(jnp.int32, (t_pad, t_pad), 1)
    valid = (ci <= ri) & (ci < t_real)               # causal mask & real keys only
    bias = jnp.where(valid, 0.0, -1e30).astype(jnp.float32)
    bias3 = jnp.broadcast_to(bias[None, :, :], (batch_tile, t_pad, t_pad))  # hoisted

    att_cat = jnp.zeros((rows, C_PAD), jnp.float32)
    for hd in range(HEADN):
        # lane mask selecting this head's 15 feature lanes (static per iteration)
        hmask = ((lane >= hd * HS) & (lane < (hd + 1) * HS)).astype(jnp.float32)
        k_h = k3 * hmask                             # zero other heads' lanes (VPU)
        s = jnp.einsum('btd,bsd->bts', q3, k_h,
                       preferred_element_type=jnp.float32) * scale + bias3
        s = s - jnp.max(s, axis=-1, keepdims=True)
        p = jnp.exp(s)
        p = p * pl.reciprocal(jnp.sum(p, axis=-1, keepdims=True), approx=True)
        o_h = jnp.einsum('bts,bsd->btd', p, v3,
                         preferred_element_type=jnp.float32)  # (bt, t_pad, C_PAD)
        # keep only this head's lanes; heads land in their packed lane slots
        att_cat = att_cat + o_h.reshape(rows, C_PAD) * hmask

    att = jnp.dot(att_cat, wp_ref[...], preferred_element_type=jnp.float32) + bp
    x1 = x + att                                     # residual 1

    # ---- LayerNorm 2 + feedforward ----
    h2 = _masked_layernorm(x1, g2, b2, fmask)
    ff = jnp.dot(h2, w1_ref[...], preferred_element_type=jnp.float32) + bb1_ref[...]
    ff = jnp.maximum(ff, 0.0)
    ff = jnp.dot(ff, w2_ref[...], preferred_element_type=jnp.float32) + bb2

    o_ref[...] = x1 + ff                             # residual 2, lane-dense store


def _pack_params(params):
    """Zero-pad / fuse the logical params into kernel-friendly, lane-aligned arrays."""
    (g1, b1, wk, wq, wv, wp, bp, g2, b2, w1, bb1, w2, bb2) = params

    def pad_c(v):
        return jnp.pad(v.reshape(-1), (0, C_PAD - N_EMB))

    pvec = jnp.stack([pad_c(g1), pad_c(b1), pad_c(g2), pad_c(b2),
                      pad_c(bp), pad_c(bb2),
                      jnp.zeros((C_PAD,), jnp.float32),
                      jnp.zeros((C_PAD,), jnp.float32)], axis=0)        # (8, C_PAD)
    bb1_p = jnp.pad(bb1, ((0, 0), (0, HID_PAD - HID)))                  # (1, HID_PAD)

    # compact fused QKV: q -> lanes [0:90], k -> [128:218], v -> [256:346]
    wqkv = jnp.zeros((C_PAD, 3 * C_PAD), jnp.float32)
    wqkv = wqkv.at[:N_EMB, 0:N_EMB].set(wq)
    wqkv = wqkv.at[:N_EMB, C_PAD:C_PAD + N_EMB].set(wk)
    wqkv = wqkv.at[:N_EMB, 2 * C_PAD:2 * C_PAD + N_EMB].set(wv)

    wp_p = jnp.zeros((C_PAD, C_PAD), jnp.float32).at[:N_EMB, :N_EMB].set(wp)
    w1_p = jnp.zeros((C_PAD, HID_PAD), jnp.float32).at[:N_EMB, :HID].set(w1)
    w2_p = jnp.zeros((HID_PAD, C_PAD), jnp.float32).at[:HID, :N_EMB].set(w2)
    return pvec, bb1_p, wqkv, wp_p, w1_p, w2_p


def block_forward(x, params):
    """x: (B, T, N_EMB) float32."""
    B, T, C = x.shape
    assert C == N_EMB
    t_pad = ((T + 7) // 8) * 8

    # largest batch-tile (divisor of B) keeping the row tile <= 512 rows; at the
    # demo size this puts the whole problem in a single grid step.
    batch_tile = 1
    for d in range(B, 0, -1):
        if B % d == 0 and d * t_pad <= 512:
            batch_tile = d
            break
    grid = (B // batch_tile,)
    rows_blk = batch_tile * t_pad

    xp = jnp.zeros((B, t_pad, C_PAD), jnp.float32).at[:, :T, :C].set(x)
    xp = xp.reshape(B * t_pad, C_PAD)

    packed = _pack_params(params)
    kern = functools.partial(block_kernel, batch_tile=batch_tile,
                             t_pad=t_pad, t_real=T)

    def wspec(shape):
        return pl.BlockSpec(shape, lambda i, _n=len(shape): (0,) * _n)

    out = pl.pallas_call(
        kern,
        out_shape=jax.ShapeDtypeStruct((B * t_pad, C_PAD), jnp.float32),
        grid=grid,
        in_specs=[pl.BlockSpec((rows_blk, C_PAD), lambda i: (i, 0))]
                + [wspec(p.shape) for p in packed],
        out_specs=pl.BlockSpec((rows_blk, C_PAD), lambda i: (i, 0)),
        compiler_params=pltpu.CompilerParams(dimension_semantics=("parallel",)),
    )(xp, *packed)

    return out.reshape(B, t_pad, C_PAD)[:, :T, :C]


def init_params(key):
    ks = jax.random.split(key, 8)
    s = 0.02
    g1 = jnp.ones((1, N_EMB), jnp.float32)
    b1 = jnp.zeros((1, N_EMB), jnp.float32)
    wk = s * jax.random.normal(ks[0], (N_EMB, HEADN * HS), jnp.float32)
    wq = s * jax.random.normal(ks[1], (N_EMB, HEADN * HS), jnp.float32)
    wv = s * jax.random.normal(ks[2], (N_EMB, HEADN * HS), jnp.float32)
    wp = s * jax.random.normal(ks[3], (N_EMB, N_EMB), jnp.float32)
    bp = s * jax.random.normal(ks[4], (1, N_EMB), jnp.float32)
    g2 = jnp.ones((1, N_EMB), jnp.float32)
    b2 = jnp.zeros((1, N_EMB), jnp.float32)
    w1 = s * jax.random.normal(ks[5], (N_EMB, HID), jnp.float32)
    bb1 = s * jax.random.normal(ks[6], (1, HID), jnp.float32)
    w2 = s * jax.random.normal(ks[7], (HID, N_EMB), jnp.float32)
    bb2 = jnp.zeros((1, N_EMB), jnp.float32)
    return (g1, b1, wk, wq, wv, wp, bp, g2, b2, w1, bb1, w2, bb2)


def block_reference(x, params):
    """Pure-JAX reference mirroring the PyTorch Block.forward (eval mode)."""
    (g1, b1, wk, wq, wv, wp, bp, g2, b2, w1, bb1, w2, bb2) = params
    B, T, C = x.shape

    def ln(z, g, b_):
        mu = jnp.mean(z, axis=-1, keepdims=True)
        var = jnp.mean((z - mu) ** 2, axis=-1, keepdims=True)
        return (z - mu) * jax.lax.rsqrt(var + LN_EPS) * g + b_

    h = ln(x, g1[0], b1[0])
    k = h @ wk
    q = h @ wq
    v = h @ wv
    kh = k.reshape(B, T, HEADN, HS)
    qh = q.reshape(B, T, HEADN, HS)
    vh = v.reshape(B, T, HEADN, HS)
    s = jnp.einsum("bthd,bshd->bhts", qh, kh) * (C ** -0.5)
    mask = jnp.tril(jnp.ones((T, T), bool))
    s = jnp.where(mask, s, -jnp.inf)
    p = jax.nn.softmax(s, axis=-1)
    att = jnp.einsum("bhts,bshd->bthd", p, vh).reshape(B, T, C)
    att = att @ wp + bp[0]
    x1 = x + att
    h2 = ln(x1, g2[0], b2[0])
    ff = jnp.maximum(h2 @ w1 + bb1[0], 0.0) @ w2 + bb2[0]
    return x1 + ff


if __name__ == "__main__":
    key = jax.random.PRNGKey(0)
    kx, kp = jax.random.split(key)

    B, T = 2, 8                        # small seq (<= LENGTH=84), n_emb fixed at 90
    x = jax.random.normal(kx, (B, T, N_EMB), jnp.float32)
    params = init_params(kp)

    out = jax.block_until_ready(block_forward(x, params))

    ref = block_reference(x, params)
    np.testing.assert_allclose(np.asarray(out), np.asarray(ref), rtol=1e-3, atol=1e-3)

    print("KERNEL_OK")
</pallas_src>

<mosaic_0001>
module attributes {stable_mosaic.version = 11 : i64} {
  func.func @block_kernel(%arg0: i32, %arg1: memref<16x128xf32, #tpu.memory_space<vmem>>, %arg2: memref<8x128xf32, #tpu.memory_space<vmem>>, %arg3: memref<1x384xf32, #tpu.memory_space<vmem>>, %arg4: memref<128x384xf32, #tpu.memory_space<vmem>>, %arg5: memref<128x128xf32, #tpu.memory_space<vmem>>, %arg6: memref<128x384xf32, #tpu.memory_space<vmem>>, %arg7: memref<384x128xf32, #tpu.memory_space<vmem>>, %arg8: memref<16x128xf32, #tpu.memory_space<vmem>>) attributes {dimension_semantics = [#tpu.dimension_semantics<parallel>], iteration_bounds = array<i64: 1>, scalar_prefetch = 0 : i64, scratch_operands = 0 : i64, tpu.core_type = #tpu.core_type<tc>, window_params = [{transform_indices = @transform_0, window_bounds = array<i64: 16, 128>}, {pipeline_mode = #tpu.pipeline_mode<synchronous>, transform_indices = @transform_1, window_bounds = array<i64: 8, 128>}, {pipeline_mode = #tpu.pipeline_mode<synchronous>, transform_indices = @transform_2, window_bounds = array<i64: 1, 384>}, {pipeline_mode = #tpu.pipeline_mode<synchronous>, transform_indices = @transform_3, window_bounds = array<i64: 128, 384>}, {pipeline_mode = #tpu.pipeline_mode<synchronous>, transform_indices = @transform_4, window_bounds = array<i64: 128, 128>}, {pipeline_mode = #tpu.pipeline_mode<synchronous>, transform_indices = @transform_5, window_bounds = array<i64: 128, 384>}, {pipeline_mode = #tpu.pipeline_mode<synchronous>, transform_indices = @transform_6, window_bounds = array<i64: 384, 128>}, {transform_indices = @transform_7, window_bounds = array<i64: 16, 128>}]} {
    %c0 = arith.constant 0 : index
    %c0_0 = arith.constant 0 : index
    %0 = vector.load %arg1[%c0, %c0_0] : memref<16x128xf32, #tpu.memory_space<vmem>>, vector<16x128xf32>
    %c0_1 = arith.constant 0 : index
    %c0_2 = arith.constant 0 : index
    %1 = vector.load %arg2[%c0_1, %c0_2] : memref<8x128xf32, #tpu.memory_space<vmem>>, vector<8x128xf32>
    %2 = vector.extract_strided_slice %1 {offsets = [0, 0], sizes = [1, 128], strides = [1, 1]} : vector<8x128xf32> to vector<1x128xf32>
    %3 = vector.extract_strided_slice %1 {offsets = [1, 0], sizes = [1, 128], strides = [1, 1]} : vector<8x128xf32> to vector<1x128xf32>
    %4 = vector.extract_strided_slice %1 {offsets = [2, 0], sizes = [1, 128], strides = [1, 1]} : vector<8x128xf32> to vector<1x128xf32>
    %5 = vector.extract_strided_slice %1 {offsets = [3, 0], sizes = [1, 128], strides = [1, 1]} : vector<8x128xf32> to vector<1x128xf32>
    %6 = vector.extract_strided_slice %1 {offsets = [4, 0], sizes = [1, 128], strides = [1, 1]} : vector<8x128xf32> to vector<1x128xf32>
    %7 = vector.extract_strided_slice %1 {offsets = [5, 0], sizes = [1, 128], strides = [1, 1]} : vector<8x128xf32> to vector<1x128xf32>
    %8 = tpu.iota {dimensions = array<i32: 1>} : vector<1x128xi32>
    %c90_i32 = arith.constant 90 : i32
    %9 = vector.broadcast %c90_i32 : i32 to vector<1x128xi32>
    %10 = arith.cmpi slt, %8, %9 : vector<1x128xi32>
    %11 = arith.extui %10 : vector<1x128xi1> to vector<1x128xi32>
    %12 = arith.sitofp %11 : vector<1x128xi32> to vector<1x128xf32>
    %13 = vector.broadcast %12 : vector<1x128xf32> to vector<16x128xf32>
    %14 = arith.mulf %0, %13 : vector<16x128xf32>
    %cst = arith.constant dense<0.000000e+00> : vector<16xf32>
    %15 = vector.multi_reduction <add>, %14, %cst [1] : vector<16x128xf32> to vector<16xf32>
    %16 = vector.shape_cast %15 : vector<16xf32> to vector<16x1xf32>
    %cst_3 = arith.constant 0.0111111114 : f32
    %17 = vector.broadcast %cst_3 : f32 to vector<16x1xf32>
    %18 = arith.mulf %16, %17 : vector<16x1xf32>
    %19 = vector.broadcast %18 : vector<16x1xf32> to vector<16x128xf32>
    %20 = arith.subf %0, %19 : vector<16x128xf32>
    %21 = vector.broadcast %12 : vector<1x128xf32> to vector<16x128xf32>
    %22 = arith.mulf %20, %21 : vector<16x128xf32>
    %23 = arith.mulf %22, %22 : vector<16x128xf32>
    %cst_4 = arith.constant dense<0.000000e+00> : vector<16xf32>
    %24 = vector.multi_reduction <add>, %23, %cst_4 [1] : vector<16x128xf32> to vector<16xf32>
    %25 = vector.shape_cast %24 : vector<16xf32> to vector<16x1xf32>
    %cst_5 = arith.constant 0.0111111114 : f32
    %26 = vector.broadcast %cst_5 : f32 to vector<16x1xf32>
    %27 = arith.mulf %25, %26 : vector<16x1xf32>
    %cst_6 = arith.constant 9.99999974E-6 : f32
    %28 = vector.broadcast %cst_6 : f32 to vector<16x1xf32>
    %29 = arith.addf %27, %28 : vector<16x1xf32>
    %30 = math.rsqrt %29 : vector<16x1xf32>
    %31 = vector.broadcast %30 : vector<16x1xf32> to vector<16x128xf32>
    %32 = arith.mulf %22, %31 : vector<16x128xf32>
    %33 = vector.broadcast %2 : vector<1x128xf32> to vector<16x128xf32>
    %34 = arith.mulf %32, %33 : vector<16x128xf32>
    %35 = vector.broadcast %3 : vector<1x128xf32> to vector<16x128xf32>
    %36 = arith.addf %34, %35 : vector<16x128xf32>
    %c0_7 = arith.constant 0 : index
    %c0_8 = arith.constant 0 : index
    %37 = vector.load %arg4[%c0_7, %c0_8] : memref<128x384xf32, #tpu.memory_space<vmem>>, vector<128x384xf32>
    %cst_9 = arith.constant dense<0.000000e+00> : vector<16x384xf32>
    %38 = tpu.matmul %36, %37, %cst_9 {dimension_numbers = #tpu.dot_dimension_numbers<[1], [0], [0], [1], [0, 0, 1, 1], [], []>} : vector<16x128xf32>, vector<128x384xf32>, vector<16x384xf32> -> vector<16x384xf32>
    %39 = vector.extract_strided_slice %38 {offsets = [0, 0], sizes = [16, 128], strides = [1, 1]} : vector<16x384xf32> to vector<16x128xf32>
    %40 = vector.shape_cast %39 : vector<16x128xf32> to vector<2x8x128xf32>
    %41 = vector.extract_strided_slice %38 {offsets = [0, 128], sizes = [16, 128], strides = [1, 1]} : vector<16x384xf32> to vector<16x128xf32>
    %42 = vector.shape_cast %41 : vector<16x128xf32> to vector<2x8x128xf32>
    %43 = vector.extract_strided_slice %38 {offsets = [0, 256], sizes = [16, 128], strides = [1, 1]} : vector<16x384xf32> to vector<16x128xf32>
    %44 = vector.shape_cast %43 : vector<16x128xf32> to vector<2x8x128xf32>
    %45 = tpu.iota {dimensions = array<i32: 0>} : vector<8x8xi32>
    %46 = tpu.iota {dimensions = array<i32: 1>} : vector<8x8xi32>
    %47 = arith.cmpi sle, %46, %45 : vector<8x8xi32>
    %c8_i32 = arith.constant 8 : i32
    %48 = vector.broadcast %c8_i32 : i32 to vector<8x8xi32>
    %49 = arith.cmpi slt, %46, %48 : vector<8x8xi32>
    %50 = arith.andi %47, %49 : vector<8x8xi1>
    %cst_10 = arith.constant 0.000000e+00 : f32
    %cst_11 = arith.constant -1.000000e+30 : f32
    %51 = vector.broadcast %cst_10 : f32 to vector<8x8xf32>
    %52 = vector.broadcast %cst_11 : f32 to vector<8x8xf32>
    %53 = arith.select %50, %51, %52 : vector<8x8xi1>, vector<8x8xf32>
    %54 = vector.shape_cast %53 : vector<8x8xf32> to vector<1x8x8xf32>
    %55 = vector.shape_cast %54 : vector<1x8x8xf32> to vector<1x8x8xf32>
    %56 = vector.broadcast %55 : vector<1x8x8xf32> to vector<2x8x8xf32>
    %cst_12 = arith.constant 0.000000e+00 : f32
    %57 = vector.broadcast %cst_12 : f32 to vector<16x128xf32>
    %c0_i32 = arith.constant 0 : i32
    %58 = vector.broadcast %c0_i32 : i32 to vector<1x128xi32>
    %59 = arith.cmpi sge, %8, %58 : vector<1x128xi32>
    %c15_i32 = arith.constant 15 : i32
    %60 = vector.broadcast %c15_i32 : i32 to vector<1x128xi32>
    %61 = arith.cmpi slt, %8, %60 : vector<1x128xi32>
    %62 = arith.andi %59, %61 : vector<1x128xi1>
    %63 = arith.extui %62 : vector<1x128xi1> to vector<1x128xi32>
    %64 = arith.sitofp %63 : vector<1x128xi32> to vector<1x128xf32>
    %65 = vector.shape_cast %64 : vector<1x128xf32> to vector<1x1x128xf32>
    %66 = vector.broadcast %65 : vector<1x1x128xf32> to vector<2x8x128xf32>
    %67 = arith.mulf %42, %66 : vector<2x8x128xf32>
    "tpu.trace_start"() <{level = 10 : i32, message = "btd,bsd->bts"}> : () -> ()
    %cst_13 = arith.constant dense<0.000000e+00> : vector<2x8x8xf32>
    %68 = tpu.matmul %40, %67, %cst_13 {dimension_numbers = #tpu.dot_dimension_numbers<[2], [2], [1], [1], [0, 0, 0, 1, 1, 1], [0], [0]>} : vector<2x8x128xf32>, vector<2x8x128xf32>, vector<2x8x8xf32> -> vector<2x8x8xf32>
    "tpu.trace_stop"() : () -> ()
    %cst_14 = arith.constant 0.105409257 : f32
    %69 = vector.broadcast %cst_14 : f32 to vector<2x8x8xf32>
    %70 = arith.mulf %68, %69 : vector<2x8x8xf32>
    %71 = arith.addf %70, %56 : vector<2x8x8xf32>
    %cst_15 = arith.constant dense<0xFF800000> : vector<2x8xf32>
    %72 = vector.multi_reduction <maximumf>, %71, %cst_15 [2] : vector<2x8x8xf32> to vector<2x8xf32>
    %73 = vector.shape_cast %72 : vector<2x8xf32> to vector<2x8x1xf32>
    %74 = vector.broadcast %73 : vector<2x8x1xf32> to vector<2x8x8xf32>
    %75 = arith.subf %71, %74 : vector<2x8x8xf32>
    %76 = math.exp %75 : vector<2x8x8xf32>
    %cst_16 = arith.constant dense<0.000000e+00> : vector<2x8xf32>
    %77 = vector.multi_reduction <add>, %76, %cst_16 [2] : vector<2x8x8xf32> to vector<2x8xf32>
    %78 = vector.shape_cast %77 : vector<2x8xf32> to vector<2x8x1xf32>
    %79 = tpu.reciprocal %78 {approx = true} : vector<2x8x1xf32> -> vector<2x8x1xf32>
    %80 = vector.broadcast %79 : vector<2x8x1xf32> to vector<2x8x8xf32>
    %81 = arith.mulf %76, %80 : vector<2x8x8xf32>
    "tpu.trace_start"() <{level = 10 : i32, message = "bts,bsd->btd"}> : () -> ()
    %cst_17 = arith.constant dense<0.000000e+00> : vector<2x8x128xf32>
    %82 = tpu.matmul %81, %44, %cst_17 {dimension_numbers = #tpu.dot_dimension_numbers<[2], [1], [1], [2], [0, 0, 0, 1, 1, 2], [0], [0]>} : vector<2x8x8xf32>, vector<2x8x128xf32>, vector<2x8x128xf32> -> vector<2x8x128xf32>
    "tpu.trace_stop"() : () -> ()
    %83 = vector.shape_cast %82 : vector<2x8x128xf32> to vector<16x128xf32>
    %84 = vector.broadcast %64 : vector<1x128xf32> to vector<16x128xf32>
    %85 = arith.mulf %83, %84 : vector<16x128xf32>
    %86 = arith.addf %57, %85 : vector<16x128xf32>
    %c15_i32_18 = arith.constant 15 : i32
    %87 = vector.broadcast %c15_i32_18 : i32 to vector<1x128xi32>
    %88 = arith.cmpi sge, %8, %87 : vector<1x128xi32>
    %c30_i32 = arith.constant 30 : i32
    %89 = vector.broadcast %c30_i32 : i32 to vector<1x128xi32>
    %90 = arith.cmpi slt, %8, %89 : vector<1x128xi32>
    %91 = arith.andi %88, %90 : vector<1x128xi1>
    %92 = arith.extui %91 : vector<1x128xi1> to vector<1x128xi32>
    %93 = arith.sitofp %92 : vector<1x128xi32> to vector<1x128xf32>
    %94 = vector.shape_cast %93 : vector<1x128xf32> to vector<1x1x128xf32>
    %95 = vector.broadcast %94 : vector<1x1x128xf32> to vector<2x8x128xf32>
    %96 = arith.mulf %42, %95 : vector<2x8x128xf32>
    "tpu.trace_start"() <{level = 10 : i32, message = "btd,bsd->bts"}> : () -> ()
    %cst_19 = arith.constant dense<0.000000e+00> : vector<2x8x8xf32>
    %97 = tpu.matmul %40, %96, %cst_19 {dimension_numbers = #tpu.dot_dimension_numbers<[2], [2], [1], [1], [0, 0, 0, 1, 1, 1], [0], [0]>} : vector<2x8x128xf32>, vector<2x8x128xf32>, vector<2x8x8xf32> -> vector<2x8x8xf32>
    "tpu.trace_stop"() : () -> ()
    %cst_20 = arith.constant 0.105409257 : f32
    %98 = vector.broadcast %cst_20 : f32 to vector<2x8x8xf32>
    %99 = arith.mulf %97, %98 : vector<2x8x8xf32>
    %100 = arith.addf %99, %56 : vector<2x8x8xf32>
    %cst_21 = arith.constant dense<0xFF800000> : vector<2x8xf32>
    %101 = vector.multi_reduction <maximumf>, %100, %cst_21 [2] : vector<2x8x8xf32> to vector<2x8xf32>
    %102 = vector.shape_cast %101 : vector<2x8xf32> to vector<2x8x1xf32>
    %103 = vector.broadcast %102 : vector<2x8x1xf32> to vector<2x8x8xf32>
    %104 = arith.subf %100, %103 : vector<2x8x8xf32>
    %105 = math.exp %104 : vector<2x8x8xf32>
    %cst_22 = arith.constant dense<0.000000e+00> : vector<2x8xf32>
    %106 = vector.multi_reduction <add>, %105, %cst_22 [2] : vector<2x8x8xf32> to vector<2x8xf32>
    %107 = vector.shape_cast %106 : vector<2x8xf32> to vector<2x8x1xf32>
    %108 = tpu.reciprocal %107 {approx = true} : vector<2x8x1xf32> -> vector<2x8x1xf32>
    %109 = vector.broadcast %108 : vector<2x8x1xf32> to vector<2x8x8xf32>
    %110 = arith.mulf %105, %109 : vector<2x8x8xf32>
    "tpu.trace_start"() <{level = 10 : i32, message = "bts,bsd->btd"}> : () -> ()
    %cst_23 = arith.constant dense<0.000000e+00> : vector<2x8x128xf32>
    %111 = tpu.matmul %110, %44, %cst_23 {dimension_numbers = #tpu.dot_dimension_numbers<[2], [1], [1], [2], [0, 0, 0, 1, 1, 2], [0], [0]>} : vector<2x8x8xf32>, vector<2x8x128xf32>, vector<2x8x128xf32> -> vector<2x8x128xf32>
    "tpu.trace_stop"() : () -> ()
    %112 = vector.shape_cast %111 : vector<2x8x128xf32> to vector<16x128xf32>
    %113 = vector.broadcast %93 : vector<1x128xf32> to vector<16x128xf32>
    %114 = arith.mulf %112, %113 : vector<16x128xf32>
    %115 = arith.addf %86, %114 : vector<16x128xf32>
    %c30_i32_24 = arith.constant 30 : i32
    %116 = vector.broadcast %c30_i32_24 : i32 to vector<1x128xi32>
    %117 = arith.cmpi sge, %8, %116 : vector<1x128xi32>
    %c45_i32 = arith.constant 45 : i32
    %118 = vector.broadcast %c45_i32 : i32 to vector<1x128xi32>
    %119 = arith.cmpi slt, %8, %118 : vector<1x128xi32>
    %120 = arith.andi %117, %119 : vector<1x128xi1>
    %121 = arith.extui %120 : vector<1x128xi1> to vector<1x128xi32>
    %122 = arith.sitofp %121 : vector<1x128xi32> to vector<1x128xf32>
    %123 = vector.shape_cast %122 : vector<1x128xf32> to vector<1x1x128xf32>
    %124 = vector.broadcast %123 : vector<1x1x128xf32> to vector<2x8x128xf32>
    %125 = arith.mulf %42, %124 : vector<2x8x128xf32>
    "tpu.trace_start"() <{level = 10 : i32, message = "btd,bsd->bts"}> : () -> ()
    %cst_25 = arith.constant dense<0.000000e+00> : vector<2x8x8xf32>
    %126 = tpu.matmul %40, %125, %cst_25 {dimension_numbers = #tpu.dot_dimension_numbers<[2], [2], [1], [1], [0, 0, 0, 1, 1, 1], [0], [0]>} : vector<2x8x128xf32>, vector<2x8x128xf32>, vector<2x8x8xf32> -> vector<2x8x8xf32>
    "tpu.trace_stop"() : () -> ()
    %cst_26 = arith.constant 0.105409257 : f32
    %127 = vector.broadcast %cst_26 : f32 to vector<2x8x8xf32>
    %128 = arith.mulf %126, %127 : vector<2x8x8xf32>
    %129 = arith.addf %128, %56 : vector<2x8x8xf32>
    %cst_27 = arith.constant dense<0xFF800000> : vector<2x8xf32>
    %130 = vector.multi_reduction <maximumf>, %129, %cst_27 [2] : vector<2x8x8xf32> to vector<2x8xf32>
    %131 = vector.shape_cast %130 : vector<2x8xf32> to vector<2x8x1xf32>
    %132 = vector.broadcast %131 : vector<2x8x1xf32> to vector<2x8x8xf32>
    %133 = arith.subf %129, %132 : vector<2x8x8xf32>
    %134 = math.exp %133 : vector<2x8x8xf32>
    %cst_28 = arith.constant dense<0.000000e+00> : vector<2x8xf32>
    %135 = vector.multi_reduction <add>, %134, %cst_28 [2] : vector<2x8x8xf32> to vector<2x8xf32>
    %136 = vector.shape_cast %135 : vector<2x8xf32> to vector<2x8x1xf32>
    %137 = tpu.reciprocal %136 {approx = true} : vector<2x8x1xf32> -> vector<2x8x1xf32>
    %138 = vector.broadcast %137 : vector<2x8x1xf32> to vector<2x8x8xf32>
    %139 = arith.mulf %134, %138 : vector<2x8x8xf32>
    "tpu.trace_start"() <{level = 10 : i32, message = "bts,bsd->btd"}> : () -> ()
    %cst_29 = arith.constant dense<0.000000e+00> : vector<2x8x128xf32>
    %140 = tpu.matmul %139, %44, %cst_29 {dimension_numbers = #tpu.dot_dimension_numbers<[2], [1], [1], [2], [0, 0, 0, 1, 1, 2], [0], [0]>} : vector<2x8x8xf32>, vector<2x8x128xf32>, vector<2x8x128xf32> -> vector<2x8x128xf32>
    "tpu.trace_stop"() : () -> ()
    %141 = vector.shape_cast %140 : vector<2x8x128xf32> to vector<16x128xf32>
    %142 = vector.broadcast %122 : vector<1x128xf32> to vector<16x128xf32>
    %143 = arith.mulf %141, %142 : vector<16x128xf32>
    %144 = arith.addf %115, %143 : vector<16x128xf32>
    %c45_i32_30 = arith.constant 45 : i32
    %145 = vector.broadcast %c45_i32_30 : i32 to vector<1x128xi32>
    %146 = arith.cmpi sge, %8, %145 : vector<1x128xi32>
    %c60_i32 = arith.constant 60 : i32
    %147 = vector.broadcast %c60_i32 : i32 to vector<1x128xi32>
    %148 = arith.cmpi slt, %8, %147 : vector<1x128xi32>
    %149 = arith.andi %146, %148 : vector<1x128xi1>
    %150 = arith.extui %149 : vector<1x128xi1> to vector<1x128xi32>
    %151 = arith.sitofp %150 : vector<1x128xi32> to vector<1x128xf32>
    %152 = vector.shape_cast %151 : vector<1x128xf32> to vector<1x1x128xf32>
    %153 = vector.broadcast %152 : vector<1x1x128xf32> to vector<2x8x128xf32>
    %154 = arith.mulf %42, %153 : vector<2x8x128xf32>
    "tpu.trace_start"() <{level = 10 : i32, message = "btd,bsd->bts"}> : () -> ()
    %cst_31 = arith.constant dense<0.000000e+00> : vector<2x8x8xf32>
    %155 = tpu.matmul %40, %154, %cst_31 {dimension_numbers = #tpu.dot_dimension_numbers<[2], [2], [1], [1], [0, 0, 0, 1, 1, 1], [0], [0]>} : vector<2x8x128xf32>, vector<2x8x128xf32>, vector<2x8x8xf32> -> vector<2x8x8xf32>
    "tpu.trace_stop"() : () -> ()
    %cst_32 = arith.constant 0.105409257 : f32
    %156 = vector.broadcast %cst_32 : f32 to vector<2x8x8xf32>
    %157 = arith.mulf %155, %156 : vector<2x8x8xf32>
    %158 = arith.addf %157, %56 : vector<2x8x8xf32>
    %cst_33 = arith.constant dense<0xFF800000> : vector<2x8xf32>
    %159 = vector.multi_reduction <maximumf>, %158, %cst_33 [2] : vector<2x8x8xf32> to vector<2x8xf32>
    %160 = vector.shape_cast %159 : vector<2x8xf32> to vector<2x8x1xf32>
    %161 = vector.broadcast %160 : vector<2x8x1xf32> to vector<2x8x8xf32>
    %162 = arith.subf %158, %161 : vector<2x8x8xf32>
    %163 = math.exp %162 : vector<2x8x8xf32>
    %cst_34 = arith.constant dense<0.000000e+00> : vector<2x8xf32>
    %164 = vector.multi_reduction <add>, %163, %cst_34 [2] : vector<2x8x8xf32> to vector<2x8xf32>
    %165 = vector.shape_cast %164 : vector<2x8xf32> to vector<2x8x1xf32>
    %166 = tpu.reciprocal %165 {approx = true} : vector<2x8x1xf32> -> vector<2x8x1xf32>
    %167 = vector.broadcast %166 : vector<2x8x1xf32> to vector<2x8x8xf32>
    %168 = arith.mulf %163, %167 : vector<2x8x8xf32>
    "tpu.trace_start"() <{level = 10 : i32, message = "bts,bsd->btd"}> : () -> ()
    %cst_35 = arith.constant dense<0.000000e+00> : vector<2x8x128xf32>
    %169 = tpu.matmul %168, %44, %cst_35 {dimension_numbers = #tpu.dot_dimension_numbers<[2], [1], [1], [2], [0, 0, 0, 1, 1, 2], [0], [0]>} : vector<2x8x8xf32>, vector<2x8x128xf32>, vector<2x8x128xf32> -> vector<2x8x128xf32>
    "tpu.trace_stop"() : () -> ()
    %170 = vector.shape_cast %169 : vector<2x8x128xf32> to vector<16x128xf32>
    %171 = vector.broadcast %151 : vector<1x128xf32> to vector<16x128xf32>
    %172 = arith.mulf %170, %171 : vector<16x128xf32>
    %173 = arith.addf %144, %172 : vector<16x128xf32>
    %c60_i32_36 = arith.constant 60 : i32
    %174 = vector.broadcast %c60_i32_36 : i32 to vector<1x128xi32>
    %175 = arith.cmpi sge, %8, %174 : vector<1x128xi32>
    %c75_i32 = arith.constant 75 : i32
    %176 = vector.broadcast %c75_i32 : i32 to vector<1x128xi32>
    %177 = arith.cmpi slt, %8, %176 : vector<1x128xi32>
    %178 = arith.andi %175, %177 : vector<1x128xi1>
    %179 = arith.extui %178 : vector<1x128xi1> to vector<1x128xi32>
    %180 = arith.sitofp %179 : vector<1x128xi32> to vector<1x128xf32>
    %181 = vector.shape_cast %180 : vector<1x128xf32> to vector<1x1x128xf32>
    %182 = vector.broadcast %181 : vector<1x1x128xf32> to vector<2x8x128xf32>
    %183 = arith.mulf %42, %182 : vector<2x8x128xf32>
    "tpu.trace_start"() <{level = 10 : i32, message = "btd,bsd->bts"}> : () -> ()
    %cst_37 = arith.constant dense<0.000000e+00> : vector<2x8x8xf32>
    %184 = tpu.matmul %40, %183, %cst_37 {dimension_numbers = #tpu.dot_dimension_numbers<[2], [2], [1], [1], [0, 0, 0, 1, 1, 1], [0], [0]>} : vector<2x8x128xf32>, vector<2x8x128xf32>, vector<2x8x8xf32> -> vector<2x8x8xf32>
    "tpu.trace_stop"() : () -> ()
    %cst_38 = arith.constant 0.105409257 : f32
    %185 = vector.broadcast %cst_38 : f32 to vector<2x8x8xf32>
    %186 = arith.mulf %184, %185 : vector<2x8x8xf32>
    %187 = arith.addf %186, %56 : vector<2x8x8xf32>
    %cst_39 = arith.constant dense<0xFF800000> : vector<2x8xf32>
    %188 = vector.multi_reduction <maximumf>, %187, %cst_39 [2] : vector<2x8x8xf32> to vector<2x8xf32>
    %189 = vector.shape_cast %188 : vector<2x8xf32> to vector<2x8x1xf32>
    %190 = vector.broadcast %189 : vector<2x8x1xf32> to vector<2x8x8xf32>
    %191 = arith.subf %187, %190 : vector<2x8x8xf32>
    %192 = math.exp %191 : vector<2x8x8xf32>
    %cst_40 = arith.constant dense<0.000000e+00> : vector<2x8xf32>
    %193 = vector.multi_reduction <add>, %192, %cst_40 [2] : vector<2x8x8xf32> to vector<2x8xf32>
    %194 = vector.shape_cast %193 : vector<2x8xf32> to vector<2x8x1xf32>
    %195 = tpu.reciprocal %194 {approx = true} : vector<2x8x1xf32> -> vector<2x8x1xf32>
    %196 = vector.broadcast %195 : vector<2x8x1xf32> to vector<2x8x8xf32>
    %197 = arith.mulf %192, %196 : vector<2x8x8xf32>
    "tpu.trace_start"() <{level = 10 : i32, message = "bts,bsd->btd"}> : () -> ()
    %cst_41 = arith.constant dense<0.000000e+00> : vector<2x8x128xf32>
    %198 = tpu.matmul %197, %44, %cst_41 {dimension_numbers = #tpu.dot_dimension_numbers<[2], [1], [1], [2], [0, 0, 0, 1, 1, 2], [0], [0]>} : vector<2x8x8xf32>, vector<2x8x128xf32>, vector<2x8x128xf32> -> vector<2x8x128xf32>
    "tpu.trace_stop"() : () -> ()
    %199 = vector.shape_cast %198 : vector<2x8x128xf32> to vector<16x128xf32>
    %200 = vector.broadcast %180 : vector<1x128xf32> to vector<16x128xf32>
    %201 = arith.mulf %199, %200 : vector<16x128xf32>
    %202 = arith.addf %173, %201 : vector<16x128xf32>
    %c75_i32_42 = arith.constant 75 : i32
    %203 = vector.broadcast %c75_i32_42 : i32 to vector<1x128xi32>
    %204 = arith.cmpi sge, %8, %203 : vector<1x128xi32>
    %c90_i32_43 = arith.constant 90 : i32
    %205 = vector.broadcast %c90_i32_43 : i32 to vector<1x128xi32>
    %206 = arith.cmpi slt, %8, %205 : vector<1x128xi32>
    %207 = arith.andi %204, %206 : vector<1x128xi1>
    %208 = arith.extui %207 : vector<1x128xi1> to vector<1x128xi32>
    %209 = arith.sitofp %208 : vector<1x128xi32> to vector<1x128xf32>
    %210 = vector.shape_cast %209 : vector<1x128xf32> to vector<1x1x128xf32>
    %211 = vector.broadcast %210 : vector<1x1x128xf32> to vector<2x8x128xf32>
    %212 = arith.mulf %42, %211 : vector<2x8x128xf32>
    "tpu.trace_start"() <{level = 10 : i32, message = "btd,bsd->bts"}> : () -> ()
    %cst_44 = arith.constant dense<0.000000e+00> : vector<2x8x8xf32>
    %213 = tpu.matmul %40, %212, %cst_44 {dimension_numbers = #tpu.dot_dimension_numbers<[2], [2], [1], [1], [0, 0, 0, 1, 1, 1], [0], [0]>} : vector<2x8x128xf32>, vector<2x8x128xf32>, vector<2x8x8xf32> -> vector<2x8x8xf32>
    "tpu.trace_stop"() : () -> ()
    %cst_45 = arith.constant 0.105409257 : f32
    %214 = vector.broadcast %cst_45 : f32 to vector<2x8x8xf32>
    %215 = arith.mulf %213, %214 : vector<2x8x8xf32>
    %216 = arith.addf %215, %56 : vector<2x8x8xf32>
    %cst_46 = arith.constant dense<0xFF800000> : vector<2x8xf32>
    %217 = vector.multi_reduction <maximumf>, %216, %cst_46 [2] : vector<2x8x8xf32> to vector<2x8xf32>
    %218 = vector.shape_cast %217 : vector<2x8xf32> to vector<2x8x1xf32>
    %219 = vector.broadcast %218 : vector<2x8x1xf32> to vector<2x8x8xf32>
    %220 = arith.subf %216, %219 : vector<2x8x8xf32>
    %221 = math.exp %220 : vector<2x8x8xf32>
    %cst_47 = arith.constant dense<0.000000e+00> : vector<2x8xf32>
    %222 = vector.multi_reduction <add>, %221, %cst_47 [2] : vector<2x8x8xf32> to vector<2x8xf32>
    %223 = vector.shape_cast %222 : vector<2x8xf32> to vector<2x8x1xf32>
    %224 = tpu.reciprocal %223 {approx = true} : vector<2x8x1xf32> -> vector<2x8x1xf32>
    %225 = vector.broadcast %224 : vector<2x8x1xf32> to vector<2x8x8xf32>
    %226 = arith.mulf %221, %225 : vector<2x8x8xf32>
    "tpu.trace_start"() <{level = 10 : i32, message = "bts,bsd->btd"}> : () -> ()
    %cst_48 = arith.constant dense<0.000000e+00> : vector<2x8x128xf32>
    %227 = tpu.matmul %226, %44, %cst_48 {dimension_numbers = #tpu.dot_dimension_numbers<[2], [1], [1], [2], [0, 0, 0, 1, 1, 2], [0], [0]>} : vector<2x8x8xf32>, vector<2x8x128xf32>, vector<2x8x128xf32> -> vector<2x8x128xf32>
    "tpu.trace_stop"() : () -> ()
    %228 = vector.shape_cast %227 : vector<2x8x128xf32> to vector<16x128xf32>
    %229 = vector.broadcast %209 : vector<1x128xf32> to vector<16x128xf32>
    %230 = arith.mulf %228, %229 : vector<16x128xf32>
    %231 = arith.addf %202, %230 : vector<16x128xf32>
    %c0_49 = arith.constant 0 : index
    %c0_50 = arith.constant 0 : index
    %232 = vector.load %arg5[%c0_49, %c0_50] : memref<128x128xf32, #tpu.memory_space<vmem>>, vector<128x128xf32>
    %cst_51 = arith.constant dense<0.000000e+00> : vector<16x128xf32>
    %233 = tpu.matmul %231, %232, %cst_51 {dimension_numbers = #tpu.dot_dimension_numbers<[1], [0], [0], [1], [0, 0, 1, 1], [], []>} : vector<16x128xf32>, vector<128x128xf32>, vector<16x128xf32> -> vector<16x128xf32>
    %234 = vector.broadcast %6 : vector<1x128xf32> to vector<16x128xf32>
    %235 = arith.addf %233, %234 : vector<16x128xf32>
    %236 = arith.addf %0, %235 : vector<16x128xf32>
    %237 = vector.broadcast %12 : vector<1x128xf32> to vector<16x128xf32>
    %238 = arith.mulf %236, %237 : vector<16x128xf32>
    %cst_52 = arith.constant dense<0.000000e+00> : vector<16xf32>
    %239 = vector.multi_reduction <add>, %238, %cst_52 [1] : vector<16x128xf32> to vector<16xf32>
    %240 = vector.shape_cast %239 : vector<16xf32> to vector<16x1xf32>
    %cst_53 = arith.constant 0.0111111114 : f32
    %241 = vector.broadcast %cst_53 : f32 to vector<16x1xf32>
    %242 = arith.mulf %240, %241 : vector<16x1xf32>
    %243 = vector.broadcast %242 : vector<16x1xf32> to vector<16x128xf32>
    %244 = arith.subf %236, %243 : vector<16x128xf32>
    %245 = vector.broadcast %12 : vector<1x128xf32> to vector<16x128xf32>
    %246 = arith.mulf %244, %245 : vector<16x128xf32>
    %247 = arith.mulf %246, %246 : vector<16x128xf32>
    %cst_54 = arith.constant dense<0.000000e+00> : vector<16xf32>
    %248 = vector.multi_reduction <add>, %247, %cst_54 [1] : vector<16x128xf32> to vector<16xf32>
    %249 = vector.shape_cast %248 : vector<16xf32> to vector<16x1xf32>
    %cst_55 = arith.constant 0.0111111114 : f32
    %250 = vector.broadcast %cst_55 : f32 to vector<16x1xf32>
    %251 = arith.mulf %249, %250 : vector<16x1xf32>
    %cst_56 = arith.constant 9.99999974E-6 : f32
    %252 = vector.broadcast %cst_56 : f32 to vector<16x1xf32>
    %253 = arith.addf %251, %252 : vector<16x1xf32>
    %254 = math.rsqrt %253 : vector<16x1xf32>
    %255 = vector.broadcast %254 : vector<16x1xf32> to vector<16x128xf32>
    %256 = arith.mulf %246, %255 : vector<16x128xf32>
    %257 = vector.broadcast %4 : vector<1x128xf32> to vector<16x128xf32>
    %258 = arith.mulf %256, %257 : vector<16x128xf32>
    %259 = vector.broadcast %5 : vector<1x128xf32> to vector<16x128xf32>
    %260 = arith.addf %258, %259 : vector<16x128xf32>
    %c0_57 = arith.constant 0 : index
    %c0_58 = arith.constant 0 : index
    %261 = vector.load %arg6[%c0_57, %c0_58] : memref<128x384xf32, #tpu.memory_space<vmem>>, vector<128x384xf32>
    %cst_59 = arith.constant dense<0.000000e+00> : vector<16x384xf32>
    %262 = tpu.matmul %260, %261, %cst_59 {dimension_numbers = #tpu.dot_dimension_numbers<[1], [0], [0], [1], [0, 0, 1, 1], [], []>} : vector<16x128xf32>, vector<128x384xf32>, vector<16x384xf32> -> vector<16x384xf32>
    %c0_60 = arith.constant 0 : index
    %c0_61 = arith.constant 0 : index
    %263 = vector.load %arg3[%c0_60, %c0_61] : memref<1x384xf32, #tpu.memory_space<vmem>>, vector<1x384xf32>
    %264 = vector.broadcast %263 : vector<1x384xf32> to vector<16x384xf32>
    %265 = arith.addf %262, %264 : vector<16x384xf32>
    %cst_62 = arith.constant 0.000000e+00 : f32
    %266 = vector.broadcast %cst_62 : f32 to vector<16x384xf32>
    %267 = arith.maximumf %265, %266 : vector<16x384xf32>
    %c0_63 = arith.constant 0 : index
    %c0_64 = arith.constant 0 : index
    %268 = vector.load %arg7[%c0_63, %c0_64] : memref<384x128xf32, #tpu.memory_space<vmem>>, vector<384x128xf32>
    %cst_65 = arith.constant dense<0.000000e+00> : vector<16x128xf32>
    %269 = tpu.matmul %267, %268, %cst_65 {dimension_numbers = #tpu.dot_dimension_numbers<[1], [0], [0], [1], [0, 0, 1, 1], [], []>} : vector<16x384xf32>, vector<384x128xf32>, vector<16x128xf32> -> vector<16x128xf32>
    %270 = vector.broadcast %7 : vector<1x128xf32> to vector<16x128xf32>
    %271 = arith.addf %269, %270 : vector<16x128xf32>
    %272 = arith.addf %236, %271 : vector<16x128xf32>
    %c0_66 = arith.constant 0 : index
    %c0_67 = arith.constant 0 : index
    %273 = vector.load %arg8[%c0_66, %c0_67] : memref<16x128xf32, #tpu.memory_space<vmem>>, vector<16x128xf32>
    tpu.vector_store %arg8[%c0_66, %c0_67], %272 {strides = array<i32>} : memref<16x128xf32, #tpu.memory_space<vmem>>, vector<16x128xf32>,
    return
  }
  func.func @transform_0(%arg0: i32) -> (i32, i32) {
    %c0_i32 = arith.constant 0 : i32
    %c0_i32_0 = arith.constant 0 : i32
    return %arg0, %c0_i32 : i32, i32
  }
  func.func @transform_1(%arg0: i32) -> (i32, i32) {
    %c0_i32 = arith.constant 0 : i32
    %c0_i32_0 = arith.constant 0 : i32
    %c0_i32_1 = arith.constant 0 : i32
    return %c0_i32, %c0_i32_0 : i32, i32
  }
  func.func @transform_2(%arg0: i32) -> (i32, i32) {
    %c0_i32 = arith.constant 0 : i32
    %c0_i32_0 = arith.constant 0 : i32
    %c0_i32_1 = arith.constant 0 : i32
    return %c0_i32, %c0_i32_0 : i32, i32
  }
  func.func @transform_3(%arg0: i32) -> (i32, i32) {
    %c0_i32 = arith.constant 0 : i32
    %c0_i32_0 = arith.constant 0 : i32
    %c0_i32_1 = arith.constant 0 : i32
    return %c0_i32, %c0_i32_0 : i32, i32
  }
  func.func @transform_4(%arg0: i32) -> (i32, i32) {
    %c0_i32 = arith.constant 0 : i32
    %c0_i32_0 = arith.constant 0 : i32
    %c0_i32_1 = arith.constant 0 : i32
    return %c0_i32, %c0_i32_0 : i32, i32
  }
  func.func @transform_5(%arg0: i32) -> (i32, i32) {
    %c0_i32 = arith.constant 0 : i32
    %c0_i32_0 = arith.constant 0 : i32
    %c0_i32_1 = arith.constant 0 : i32
    return %c0_i32, %c0_i32_0 : i32, i32
  }
  func.func @transform_6(%arg0: i32) -> (i32, i32) {
    %c0_i32 = arith.constant 0 : i32
    %c0_i32_0 = arith.constant 0 : i32
    %c0_i32_1 = arith.constant 0 : i32
    return %c0_i32, %c0_i32_0 : i32, i32
  }
  func.func @transform_7(%arg0: i32) -> (i32, i32) {
    %c0_i32 = arith.constant 0 : i32
    %c0_i32_0 = arith.constant 0 : i32
    return %arg0, %c0_i32 : i32, i32
  }
}

</mosaic_0001>

<bundles_post_ra>
// kernel: tpu_custom_call.1
= control target key start
LH: loop header
LB: loop body
LE: loop exit
PB: predicated region body
PF: predicated region fallthrough
CT: control target
= control target key end

     0   :  { %12 = vsyncpa [#allocation3], 0  ;;  %s4269_s0 = inlined_call_operand.hbm [shape: f32[16,128], index: 0, kind: input, shape index: {}]   ;;  %s4270_s1 = inlined_call_operand.hbm [shape: f32[8,128], index: 1, kind: input, shape index: {}]   ;;  %s4271_s2 = inlined_call_operand.vmem [shape: f32[1,384], index: 2, kind: input, shape index: {}]   ;;  %s4272_s3 = inlined_call_operand.hbm [shape: f32[128,384], index: 3, kind: input, shape index: {}]   ;;  %s4273_s4 = inlined_call_operand.hbm [shape: f32[128,128], index: 4, kind: input, shape index: {}]   ;;  %s4274_s5 = inlined_call_operand.hbm [shape: f32[128,384], index: 5, kind: input, shape index: {}]   ;;  %s4275_s6 = inlined_call_operand.hbm [shape: f32[384,128], index: 6, kind: input, shape index: {}]   ;;  %s4276_s7 = inlined_call_operand.hbm [shape: f32[16,128], index: 7, kind: output, shape index: {}]  }
   0x1   :  { %13 = vsyncpa [#allocation6], 0 }
   0x2   :  { %14 = vsyncpa [#allocation9], 0 }
   0x3   :  { %15 = vsyncpa [#allocation12], 0 }
   0x4   :  { %16 = vsyncpa [#allocation4], 0  ;;  %s3779_s24 = smov [#allocation5]   ;;  %s3615_s28 = scalar_lea.hbm %s4270_s1, 128 }
   0x5   :  { %s35_s25 = sshll.u32 %s3779_s24, 4  ;;  %p3616_p0 = scmp.ne.s32.totalorder %s4270_s1, %s3615_s28  ;;  %s36_s25 = int_to_ptr.vmem [resolvable:$true] %s35_s25 }
   0x6   :  { %p3619_p1 = scmp.lt.u32.totalorder %s3615_s28, %s4270_s1 }
   0x8   :  { %p3621_p2 = pnand %p3619_p1, %p3616_p0 }
   0xa   :  { %3624 = shalt.err (!%p3621_p2)
}
   0xb   :  { %s3625_s10 = scalar_lea.vmem %s36_s25, 128  ;;  %p3630_p4 = scmp.lt.s32.totalorder %s36_s25, %s36_s25 }
   0xc   :  { %p3626_p3 = scmp.ne.s32.totalorder %s36_s25, %s3625_s10  ;;  %p3631_p5 = scmp.lt.s32.totalorder %s3625_s10, %s3625_s10 }
   0xe   :  { %p3632_p6 = por %p3631_p5, %p3630_p4 }
  0x10   :  { %p3633_p7 = pnand %p3632_p6, %p3626_p3 }
  0x12   :  { %3636 = shalt.err (!%p3633_p7)
}
  0x13   :  { %38 = dma.hbm_to_vmem [thread:$0]  %s4270_s1, 128, %s36_s25, [#allocation6]  }
  0x14   :  { %s3780_s13 = smov [#allocation8]   ;;  %s3781_s15 = smov [#allocation2]  }
  0x15   :  { %s58_s14 = sshll.u32 %s3780_s13, 4  ;;  %s22_s16 = sshll.u32 %s3781_s15, 4  ;;  %s59_s14 = int_to_ptr.vmem [resolvable:$true] %s58_s14  ;;  %s23_s16 = int_to_ptr.vmem [resolvable:$true] %s22_s16 }
  0x16   :  { %s3637_s19 = scalar_lea.hbm %s4273_s4, 2048 }
  0x17   :  { %p3638_p8 = scmp.ne.s32.totalorder %s4273_s4, %s3637_s19  ;;  %p3641_p9 = scmp.lt.u32.totalorder %s3637_s19, %s4273_s4 }
  0x19   :  { %p3643_p10 = pnand %p3641_p9, %p3638_p8 }
  0x1b   :  { %3646 = shalt.err (!%p3643_p10)
}
  0x1c   :  { %s3647_s1 = scalar_lea.vmem %s59_s14, 2048  ;;  %p3652_p12 = scmp.lt.s32.totalorder %s59_s14, %s59_s14 }
  0x1d   :  { %p3648_p11 = scmp.ne.s32.totalorder %s59_s14, %s3647_s1  ;;  %p3653_p13 = scmp.lt.s32.totalorder %s3647_s1, %s3647_s1 }
  0x1f   :  { %p3654_p0 = por %p3653_p13, %p3652_p12 }
  0x21   :  { %p3655_p1 = pnand %p3654_p0, %p3648_p11 }
  0x23   :  { %3658 = shalt.err (!%p3655_p1)
}
  0x24   :  { %s3782_s24 = smov 128   ;;  %s3783_s25 = smov 8  }
  0x25   :  { %64 = dma.hbm_to_vmem [thread:$0]  %s4273_s4, 2048, %s59_s14, [#allocation9], %s3782_s24, %s3782_s24, %s3783_s25  }
  0x26   :  { %s3659_s30 = scalar_lea.hbm %s4269_s0, 256 }
  0x27   :  { %p3660_p2 = scmp.ne.s32.totalorder %s4269_s0, %s3659_s30  ;;  %p3663_p3 = scmp.lt.u32.totalorder %s3659_s30, %s4269_s0 }
  0x29   :  { %p3665_p4 = pnand %p3663_p3, %p3660_p2 }
  0x2b   :  { %3668 = shalt.err (!%p3665_p4)
}
  0x2c   :  { %s3669_s12 = scalar_lea.vmem %s23_s16, 256  ;;  %p3674_p6 = scmp.lt.s32.totalorder %s23_s16, %s23_s16 }
  0x2d   :  { %p3670_p5 = scmp.ne.s32.totalorder %s23_s16, %s3669_s12  ;;  %p3675_p7 = scmp.lt.s32.totalorder %s3669_s12, %s3669_s12 }
  0x2f   :  { %p3676_p8 = por %p3675_p7, %p3674_p6 }
  0x31   :  { %p3677_p9 = pnand %p3676_p8, %p3670_p5 }
  0x33   :  { %3680 = shalt.err (!%p3677_p9)
}
  0x34   :  { %28 = dma.hbm_to_vmem [thread:$0]  %s4269_s0, 256, %s23_s16, [#allocation3], %s3782_s24, %s3782_s24, %s3783_s25  }
  0x35   :  { %s3784_s14 = smov [#allocation7]   ;;  %s3681_s19 = scalar_lea.hbm %s4272_s3, 6144 }
  0x36   :  { %s46_s15 = sshll.u32 %s3784_s14, 4  ;;  %p3682_p10 = scmp.ne.s32.totalorder %s4272_s3, %s3681_s19  ;;  %s47_s15 = int_to_ptr.vmem [resolvable:$true] %s46_s15 }
  0x37   :  { %p3685_p11 = scmp.lt.u32.totalorder %s3681_s19, %s4272_s3 }
  0x39   :  { %p3687_p12 = pnand %p3685_p11, %p3682_p10 }
  0x3b   :  { %3690 = shalt.err (!%p3687_p12)
}
  0x3c   :  { %s3691_s1 = scalar_lea.vmem %s47_s15, 6144  ;;  %p3696_p0 = scmp.lt.s32.totalorder %s47_s15, %s47_s15 }
  0x3d   :  { %p3692_p13 = scmp.ne.s32.totalorder %s47_s15, %s3691_s1  ;;  %p3697_p1 = scmp.lt.s32.totalorder %s3691_s1, %s3691_s1 }
  0x3f   :  { %p3698_p2 = por %p3697_p1, %p3696_p0 }
  0x41   :  { %p3699_p3 = pnand %p3698_p2, %p3692_p13 }
  0x43   :  { %3702 = shalt.err (!%p3699_p3)
}
  0x44   :  { %s3785_s0 = smov 384   ;;  %s3786_s16 = smov 24  }
  0x45   :  { %52 = dma.hbm_to_vmem [thread:$0]  %s4272_s3, 6144, %s47_s15, [#allocation6], %s3785_s0, %s3785_s0, %s3786_s16  }
  0x46   :  { %s3787_s28 = smov [#allocation10]   ;;  %s3788_s30 = smov [#allocation11]  }
  0x47   :  { %s70_s29 = sshll.u32 %s3787_s28, 4  ;;  %s82_s8 = sshll.u32 %s3788_s30, 4  ;;  %s71_s29 = int_to_ptr.vmem [resolvable:$true] %s70_s29  ;;  %s3887_s8 = int_to_ptr.vmem [resolvable:$true] %s82_s8 }
  0x48   :  { %s3703_s11 = scalar_lea.hbm %s4274_s5, 6144 }
  0x49   :  { %p3704_p4 = scmp.ne.s32.totalorder %s4274_s5, %s3703_s11  ;;  %p3707_p5 = scmp.lt.u32.totalorder %s3703_s11, %s4274_s5 }
  0x4b   :  { %p3709_p6 = pnand %p3707_p5, %p3704_p4 }
  0x4d   :  { %3712 = shalt.err (!%p3709_p6)
}
  0x4e   :  { %s3713_s3 = scalar_lea.vmem %s71_s29, 6144  ;;  %p3718_p8 = scmp.lt.s32.totalorder %s71_s29, %s71_s29 }
  0x4f   :  { %p3714_p7 = scmp.ne.s32.totalorder %s71_s29, %s3713_s3  ;;  %p3719_p9 = scmp.lt.s32.totalorder %s3713_s3, %s3713_s3 }
  0x51   :  { %p3720_p10 = por %p3719_p9, %p3718_p8 }
  0x53   :  { %p3721_p11 = pnand %p3720_p10, %p3714_p7 }
  0x55   :  { %3724 = shalt.err (!%p3721_p11)
}
  0x56   :  { %76 = dma.hbm_to_vmem [thread:$0]  %s4274_s5, 6144, %s71_s29, [#allocation9], %s3785_s0, %s3785_s0, %s3786_s16  }
  0x57   :  { %s3725_s20 = scalar_lea.hbm %s4275_s6, 6144 }
  0x58   :  { %p3726_p12 = scmp.ne.s32.totalorder %s4275_s6, %s3725_s20  ;;  %p3729_p13 = scmp.lt.u32.totalorder %s3725_s20, %s4275_s6 }
  0x5a   :  { %p3731_p0 = pnand %p3729_p13, %p3726_p12 }
  0x5c   :  { %3734 = shalt.err (!%p3731_p0)
}
  0x5d   :  { %s3735_s26 = scalar_lea.vmem %s3887_s8, 6144  ;;  %p3740_p2 = scmp.lt.s32.totalorder %s3887_s8, %s3887_s8 }
  0x5e   :  { %p3736_p1 = scmp.ne.s32.totalorder %s3887_s8, %s3735_s26  ;;  %p3741_p3 = scmp.lt.s32.totalorder %s3735_s26, %s3735_s26 }
  0x60   :  { %p3742_p4 = por %p3741_p3, %p3740_p2 }
  0x62   :  { %p3743_p5 = pnand %p3742_p4, %p3736_p1 }
  0x64   :  { %3746 = shalt.err (!%p3743_p5)
}
  0x65   :  { %88 = dma.hbm_to_vmem [thread:$0]  %s4275_s6, 6144, %s3887_s8, [#allocation12], %s3782_s24, %s3782_s24, %s3783_s25  }
  0x66   :  { %3769 = dma.done.wait [#allocation3], 256  }
  0x67   :  { %3770 = vsyncadd [#allocation3], 4294967040 }
  0x68   :  { %3771 = dma.done.wait [#allocation6], 6272  }
  0x69   :  { %3772 = vsyncadd [#allocation6], 4294961024 }
  0x6a   :  { %3773 = dma.done.wait [#allocation9], 8192  }
  0x6b   :  { %3774 = vsyncadd [#allocation9], 4294959104 }
  0x6c   :  { %3775 = dma.done.wait [#allocation12], 6144  }
  0x6d   :  { %3776 = vsyncadd [#allocation12], 4294961152  ;;  %v110_v0 = vlaneseq  ;;  %v3789_v1 = vmov 0.0   ;;  %v107_v4 = vld [vmem:[#allocation2] sm:$0xff]  ;;  %v108_v5 = vld [vmem:[#allocation2 + $0x8] sm:$0xff]  ;;  %vm3790_vm1 = vmmov 0  }
  0x6e   :  { %265 = vmatprep.mubr.f32.mxu0 %v3789_v1  ;;  %v154_v8 = vld [vmem:[#allocation7 + $0x8] sm:$0xff]  ;;  %v157_v9 = vld [vmem:[#allocation7 + $0x20] sm:$0xff]  ;;  %v156_v12 = vld [vmem:[#allocation7 + $0x18] sm:$0xff]  ;;  %vm510_vm6 = vcmask 64512  }
  0x6f   :  { %v3923_v2 = vand.u32 127, %v110_v0  ;;  %v153_v10 = vld [vmem:[#allocation7] sm:$0xff]  ;;  %v3318_v11 = vpack.c.bf16 %v157_v9, %v154_v8  ;;  %v160_v13 = vld [vmem:[#allocation7 + $0x38] sm:$0xff]  ;;  %v163_v14 = vld [vmem:[#allocation7 + $0x50] sm:$0xff] }
  0x70   :  { %v3320_v15 = vpack.c.bf16 %v156_v12, %v153_v10  ;;  %v3322_v16 = vpack.c.bf16 %v163_v14, %v160_v13  ;;  %v155_v17 = vld [vmem:[#allocation7 + $0x10] sm:$0xff]  ;;  %v158_v18 = vld [vmem:[#allocation7 + $0x28] sm:$0xff]  ;;  %v169_v23 = vld [vmem:[#allocation7 + $0x80] sm:$0xff] }
  0x71   :  { %vm112_vm0 = vcmp.lt.s32.totalorder %v3923_v2, 90  ;;  %v159_v19 = vld [vmem:[#allocation7 + $0x30] sm:$0xff]  ;;  %3319 = vmatprep.subr.bf16.mxu0 %v3318_v11  ;;  %v3350_v20 = vpack.c.bf16 %v158_v18, %v155_v17  ;;  %v162_v21 = vld [vmem:[#allocation7 + $0x48] sm:$0xff]  ;;  %v161_v25 = vld [vmem:[#allocation7 + $0x40] sm:$0xff]  ;;  %vm360_vm2 = vcmp.lt.s32.totalorder %v3923_v2, 15  ;;  %vm356_vm4 = vcmp.lt.s32.totalorder %v3923_v2, 8 }
  0x72   :  { %v3929_v3 = vsel %vm112_vm0, 1.0, %v3789_v1  ;;  %v166_v22 = vld [vmem:[#allocation7 + $0x68] sm:$0xff]  ;;  %3321 = vmatpush1.bf16.msra.mxu0 %v3320_v15  ;;  %v3324_v24 = vpack.c.bf16 %v162_v21, %v159_v19  ;;  %v164_v26 = vld [vmem:[#allocation7 + $0x58] sm:$0xff]  ;;  %v165_v29 = vld [vmem:[#allocation7 + $0x60] sm:$0xff]  ;;  %vm683_vm7 = vcmp.ge.s32.totalorder %v3923_v2, 15  ;;  %vm684_vm8 = vcmp.lt.s32.totalorder %v3923_v2, 30 }
  0x73   :  { %v115_v6 = vmul.f32 %v3929_v3, %v107_v4  ;;  %v116_v7 = vmul.f32 %v3929_v3, %v108_v5  ;;  %3323 = vmatprep.subr.bf16.mxu0 %v3322_v16  ;;  %3351 = vmatprep.subr.bf16.mxu1 %v3350_v20  ;;  %v3326_v27 = vpack.c.bf16 %v169_v23, %v166_v22  ;;  %v168_v30 = vld [vmem:[#allocation7 + $0x78] sm:$0xff]  ;;  %v175_v43 = vld [vmem:[#allocation7 + $0xb0] sm:$0xff]  ;;  %v170_v46 = vld [vmem:[#allocation7 + $0x88] sm:$0xff]  ;;  %vm1006_vm10 = vcmp.ge.s32.totalorder %v3923_v2, 30 }
  0x74   :  { %v3354_v28 = vpack.c.bf16 %v164_v26, %v161_v25  ;;  %3353 = vmatpush3.bf16.msra.mxu1 %v3350_v20  ;;  %v3328_v31 = vpack.c.bf16 %v168_v30, %v165_v29  ;;  %v172_v42 = vld [vmem:[#allocation7 + $0x98] sm:$0xff]  ;;  %v167_v44 = vld [vmem:[#allocation7 + $0x70] sm:$0xff]  ;;  %v174_v48 = vld [vmem:[#allocation7 + $0xa8] sm:$0xff]  ;;  %vm1007_vm11 = vcmp.lt.s32.totalorder %v3923_v2, 45  ;;  %vm1329_vm13 = vcmp.ge.s32.totalorder %v3923_v2, 45 }
  0x75   :  { %117 = vadd.xlane.f32.xlu0 %v115_v6  ;;  %v3330_v45 = vpack.c.bf16 %v175_v43, %v172_v42  ;;  %v171_v47 = vld [vmem:[#allocation7 + $0x90] sm:$0xff]  ;;  %v3358_v49 = vpack.c.bf16 %v170_v46, %v167_v44  ;;  %v178_v51 = vld [vmem:[#allocation7 + $0xc8] sm:$0xff]  ;;  %v181_v52 = vld [vmem:[#allocation7 + $0xe0] sm:$0xff]  ;;  %vm1330_vm14 = vcmp.lt.s32.totalorder %v3923_v2, 60 }
  0x76   :  { %3355 = vmatprep.subr.bf16.mxu1 %v3354_v28  ;;  %3325 = vmatpush1.bf16.msra.mxu0 %v3324_v24  ;;  %v3332_v50 = vpack.c.bf16 %v174_v48, %v171_v47  ;;  %v173_v53 = vld [vmem:[#allocation7 + $0xa0] sm:$0xff]  ;;  %v3334_v54 = vpack.c.bf16 %v181_v52, %v178_v51  ;;  %v176_v55 = vld [vmem:[#allocation7 + $0xb8] sm:$0xff]  ;;  %v187_v61 = vld [vmem:[#allocation7 + $0x110] sm:$0xff] }
  0x77   :  { %3327 = vmatprep.subr.bf16.mxu0 %v3326_v27  ;;  %v177_v56 = vld [vmem:[#allocation7 + $0xc0] sm:$0xff]  ;;  %v180_v57 = vld [vmem:[#allocation7 + $0xd8] sm:$0xff]  ;;  %v3362_v58 = vpack.c.bf16 %v176_v55, %v173_v53  ;;  %v179_v62 = vld [vmem:[#allocation7 + $0xd0] sm:$0xff] }
  0x78   :  { %3357 = vmatpush3.bf16.msra.mxu1 %v3354_v28  ;;  %v3336_v59 = vpack.c.bf16 %v180_v57, %v177_v56  ;;  %v184_v60 = vld [vmem:[#allocation7 + $0xf8] sm:$0xff]  ;;  %v186_v6 = vld [vmem:[#allocation7 + $0x108] sm:$0xff]  ;;  %v193_v10 = vld [vmem:[#allocation7 + $0x140] sm:$0xff] }
  0x79   :  { %119 = vadd.xlane.f32.xlu0 %v116_v7  ;;  %3359 = vmatprep.subr.bf16.mxu1 %v3358_v49  ;;  %v3338_v63 = vpack.c.bf16 %v187_v61, %v184_v60  ;;  %v190_v9 = vld [vmem:[#allocation7 + $0x128] sm:$0xff]  ;;  %v185_v11 = vld [vmem:[#allocation7 + $0x100] sm:$0xff]  ;;  %v188_v13 = vld [vmem:[#allocation7 + $0x118] sm:$0xff] }
  0x7a   :  { %3329 = vmatpush1.bf16.msra.mxu0 %v3328_v31  ;;  %v3342_v12 = vpack.c.bf16 %v193_v10, %v190_v9  ;;  %v189_v14 = vld [vmem:[#allocation7 + $0x120] sm:$0xff]  ;;  %v192_v15 = vld [vmem:[#allocation7 + $0x138] sm:$0xff]  ;;  %v3370_v16 = vpack.c.bf16 %v188_v13, %v185_v11  ;;  %v199_v19 = vld [vmem:[#allocation7 + $0x170] sm:$0xff] }
  0x7b   :  { %3331 = vmatprep.subr.bf16.mxu0 %v3330_v45  ;;  %v3344_v17 = vpack.c.bf16 %v192_v15, %v189_v14  ;;  %v196_v18 = vld [vmem:[#allocation7 + $0x158] sm:$0xff]  ;;  %v191_v20 = vld [vmem:[#allocation7 + $0x130] sm:$0xff]  ;;  %v194_v22 = vld [vmem:[#allocation7 + $0x148] sm:$0xff] }
  0x7c   :  { %3361 = vmatpush3.bf16.msra.mxu1 %v3358_v49  ;;  %v3346_v21 = vpack.c.bf16 %v199_v19, %v196_v18  ;;  %v195_v23 = vld [vmem:[#allocation7 + $0x150] sm:$0xff]  ;;  %v198_v24 = vld [vmem:[#allocation7 + $0x168] sm:$0xff]  ;;  %v3374_v25 = vpack.c.bf16 %v194_v22, %v191_v20  ;;  %v197_v27 = vld [vmem:[#allocation7 + $0x160] sm:$0xff] }
  0x7d   :  { %3363 = vmatprep.subr.bf16.mxu1 %v3362_v58  ;;  %v3348_v26 = vpack.c.bf16 %v198_v24, %v195_v23  ;;  %v200_v28 = vld [vmem:[#allocation7 + $0x178] sm:$0xff]  ;;  %vm685_vm9 = vmand %vm683_vm7, %vm684_vm8 }
  0x7e   :  { %3333 = vmatpush1.bf16.msra.mxu0 %v3332_v50  ;;  %v3378_v29 = vpack.c.bf16 %v200_v28, %v197_v27  ;;  %vm1008_vm12 = vmand %vm1006_vm10, %vm1007_vm11 }
  0x7f   :  { %3335 = vmatprep.subr.bf16.mxu0 %v3334_v54  ;;  %vm1331_vm15 = vmand %vm1329_vm13, %vm1330_vm14 }
  0x80   :  { %3365 = vmatpush3.bf16.msra.mxu1 %v3362_v58 }
  0x82   :  { %3337 = vmatpush1.bf16.msra.mxu0 %v3336_v59  ;;  %v3791_v59 = vmov -1e+30  }
  0x83   :  { %3339 = vmatprep.subr.bf16.mxu0 %v3338_v63 }
 0x102   :  { %v118_v32 = vpop.xlane.xlu0 %117 }
 0x103   :  { %v121_v33 = vmul.f32 0.011111111, %v118_v32 }
 0x105   :  { %v123_v34 = vsub.f32 %v107_v4, %v121_v33  ;;  %v182_v4 = vld [vmem:[#allocation7 + $0xe8] sm:$0xff] }
 0x106   :  { %v120_v35 = vpop.xlane.xlu0 %119  ;;  %v3366_v7 = vpack.c.bf16 %v182_v4, %v179_v62 }
 0x107   :  { %v122_v36 = vmul.f32 0.011111111, %v120_v35  ;;  %v3934_v37 = vmul.f32 %v3929_v3, %v123_v34  ;;  %v3946_v35 = vshrl.u32 %v110_v0, 7 }
 0x108   :  { %3367 = vmatprep.subr.bf16.mxu1 %v3366_v7 }
 0x109   :  { %v124_v38 = vsub.f32 %v108_v5, %v122_v36  ;;  %v127_v39 = vmul.f32 %v3934_v37, %v3934_v37  ;;  %v183_v5 = vld [vmem:[#allocation7 + $0xf0] sm:$0xff]  ;;  %3369 = vmatpush3.bf16.msra.mxu1 %v3366_v7  ;;  %vm355_vm3 = vcmp.le.s32.totalorder %v3923_v2, %v3946_v35 }
 0x10a   :  { %v3340_v8 = vpack.c.bf16 %v186_v6, %v183_v5  ;;  %3371 = vmatprep.subr.bf16.mxu1 %v3370_v16  ;;  %vm357_vm5 = vmand %vm355_vm3, %vm356_vm4  ;;  %vm1653_vm3 = vcmp.lt.s32.totalorder %v3923_v2, 75 }
 0x10b   :  { %129 = vadd.xlane.f32.xlu1 %v127_v39  ;;  %v3939_v40 = vmul.f32 %v3929_v3, %v124_v38  ;;  %v143_v38 = vsub.s32 0, %v3946_v35  ;;  %v3949_v39 = vld [vmem:[#allocation5] sm:$0xff]  ;;  %v4000_v60 = vsel %vm357_vm5, 0.0, %v3791_v59  ;;  %vm1975_vm5 = vcmp.ge.s32.totalorder %v3923_v2, 75 }
 0x10c   :  { %3341 = vmatpush1.bf16.msra.mxu0 %v3340_v8  ;;  %vm1976_vm7 = vmand %vm1975_vm5, %vm112_vm0 }
 0x10d   :  { %v128_v41 = vmul.f32 %v3939_v40, %v3939_v40  ;;  %3343 = vmatprep.subr.bf16.mxu0 %v3342_v12  ;;  %3373 = vmatpush3.bf16.msra.mxu1 %v3370_v16  ;;  %v144_v42 = vrot.slane %v3949_v39, %v143_v38 }
 0x10e   :  { %3375 = vmatprep.subr.bf16.mxu1 %v3374_v25 }
 0x10f   :  { %131 = vadd.xlane.f32.xlu1 %v128_v41  ;;  %v149_v41 = vsub.s32 1, %v3946_v35 }
 0x110   :  { %3345 = vmatpush1.bf16.msra.mxu0 %v3344_v17 }
 0x111   :  { %3347 = vmatprep.subr.bf16.mxu0 %v3346_v21  ;;  %3377 = vmatpush3.bf16.msra.mxu1 %v3374_v25  ;;  %v150_v0 = vrot.slane %v3949_v39, %v149_v41 }
 0x112   :  { %3379 = vmatprep.subr.bf16.mxu1 %v3378_v29 }
 0x114   :  { %3349 = vmatpush1.bf16.msra.mxu0 %v3348_v26  ;;  %v4016_v26 = vsel %vm685_vm9, 1.0, %v3789_v1 }
 0x115   :  { %3093 = vmatprep.subr.mxu0 %v3789_v1  ;;  %3381 = vmatpush3.bf16.msra.mxu1 %v3378_v29 }
 0x116   :  { %3123 = vmatprep.subr.mxu1 %v3789_v1 }
 0x198   :  { %v130_v30 = vpop.xlane.xlu1 %129 }
 0x199   :  { %v133_v31 = vmul.f32 0.011111111, %v130_v30 }
 0x19b   :  { %v135_v32 = vadd.f32 1e-05, %v133_v31 }
 0x19c   :  { %v132_v33 = vpop.xlane.xlu1 %131 }
 0x19d   :  { %3556 = vrsqrt.f32 %v135_v32  ;;  %v134_v34 = vmul.f32 0.011111111, %v132_v33 }
 0x19f   :  { %v136_v36 = vadd.f32 1e-05, %v134_v34 }
 0x1a1   :  { %3558 = vrsqrt.f32 %v136_v36 }
 0x1a7   :  { %v3557_v43 = vpop.eup %3556 }
 0x1a8   :  { %v139_v44 = vmul.f32 %v3557_v43, %v3934_v37  ;;  %v3967_v37 = vsel %vm360_vm2, 1.0, %v3789_v1  ;;  %vm1652_vm2 = vcmp.ge.s32.totalorder %v3923_v2, 60 }
 0x1a9   :  { %vm1654_vm4 = vmand %vm1652_vm2, %vm1653_vm3 }
 0x1aa   :  { %v145_v45 = vmul.f32 %v144_v42, %v139_v44 }
 0x1ab   :  { %v3559_v46 = vpop.eup %3558 }
 0x1ac   :  { %v151_v47 = vadd.f32 %v150_v0, %v145_v45  ;;  %v140_v48 = vmul.f32 %v3559_v46, %v3939_v40 }
 0x1ae   :  { %266 = vmatmul.mubr.f32.vlgmr.msra.gmra.mrb[0].mxu0 %v151_v47  ;;  %3090 = vmatprep.mubr.f32.mxu1 %v151_v47  ;;  %v146_v49 = vmul.f32 %v144_v42, %v140_v48 }
 0x1af   :  { %271 = vmatprep.mubr.f32.mxu0 %v3789_v1 }
 0x1b0   :  { %v152_v50 = vadd.f32 %v150_v0, %v146_v49 }
 0x1b2   :  { %272 = vmatmul.mubr.f32.gmra.mrb[2].mxu0 %v152_v50  ;;  %3091 = vmatmul.mubr.f32.vlgmr.msra.gmra.mrb[0].mxu1 %v152_v50 }
 0x1b3   :  { %3095 = vmatprep.mubr.msk.f32.mxu0 %vm3790_vm1, %v3789_v1  ;;  %3125 = vmatprep.mubr.msk.f32.mxu1 %vm3790_vm1, %v3789_v1 }
 0x281   :  { %v3969_v40 = vpop.f32.mrb[0].mxu0 }
 0x282   :  { %v3971_v51 = vpop.f32.mrb[1].mxu0 }
 0x283   :  { %v364_v52 = vmul.f32 %v3967_v37, %v3971_v51  ;;  %v688_v27 = vmul.f32 %v4016_v26, %v3971_v51 }
 0x285   :  { %v3975_v53 = vpop.f32.mrb[2].mxu0  ;;  %v3977_v54 = vpop.f32.mrb[0].mxu1  ;;  %3094 = vmatpush3.xpose.msra.mxu0 %v364_v52 }
 0x286   :  { %v3979_v55 = vpop.f32.mrb[3].mxu0  ;;  %v3981_v56 = vpop.f32.mrb[1].mxu1  ;;  %3098 = vmatprep.subr.mxu0 %v3789_v1 }
 0x287   :  { %3124 = vmatpush3.msra.mxu1 %v3981_v56  ;;  %v365_v57 = vmul.f32 %v3967_v37, %v3979_v55  ;;  %v689_v28 = vmul.f32 %v4016_v26, %v3979_v55 }
 0x288   :  { %3096 = vmatmul.mubr.f32.vlgmr.msra.gmra.mrb[4].mxu0 %v3969_v40  ;;  %3133 = vmatprep.subr.mxu1 %v3789_v1 }
 0x289   :  { %3099 = vmatpush3.xpose.msra.mxu0 %v365_v57  ;;  %3100 = vmatprep.mubr.msk.f32.mxu0 %vm3790_vm1, %v3789_v1 }
 0x28a   :  { %3103 = vmatprep.subr.mxu0 %v3789_v1 }
 0x28c   :  { %3101 = vmatmul.mubr.f32.vlgmr.msra.gmra.mrb[6].mxu0 %v3975_v53 }
 0x28d   :  { %3104 = vmatpush3.msra.mxu0 %v3981_v56  ;;  %3105 = vmatprep.mubr.msk.f32.mxu0 %vm3790_vm1, %v3789_v1 }
 0x28e   :  { %3108 = vmatprep.subr.mxu0 %v3789_v1 }
 0x35b   :  { %v432_v58 = vpop.f32.mrb[4].mxu0 }
 0x35c   :  { %v506_v61 = vmul.f32 0.10540926, %v432_v58  ;;  %v3097_v62 = vpop.f32.mrb[5].mxu0 }
 0x35e   :  { %v508_v63 = vadd.f32 %v506_v61, %v4000_v60 }
 0x35f   :  { %v502_v4 = vpop.f32.mrb[6].mxu0 }
 0x360   :  { %v507_v5 = vmul.f32 0.10540926, %v502_v4  ;;  %v3102_v6 = vpop.f32.mrb[7].mxu0  ;;  %v511_v7 = vsel %vm510_vm6, %v508_v63, -inf }
 0x361   :  { %512 = vmax.xlane.f32.xlu0 %v511_v7  ;;  %v4046_v6 = vsel %vm1008_vm12, 1.0, %v3789_v1 }
 0x362   :  { %v509_v8 = vadd.f32 %v507_v5, %v4000_v60 }
 0x364   :  { %v514_v9 = vsel %vm510_vm6, %v509_v8, -inf }
 0x365   :  { %515 = vmax.xlane.f32.xlu1 %v514_v9  ;;  %v1011_v9 = vmul.f32 %v4046_v6, %v3971_v51 }
 0x3ee   :  { %v513_v10 = vpop.xlane.xlu0 %512 }
 0x3ef   :  { %v517_v11 = vsub.f32 %v508_v63, %v513_v10 }
 0x3f1   :  { %v519_v12 = vmul.f32 1.442695, %v517_v11 }
 0x3f2   :  { %v516_v13 = vpop.xlane.xlu1 %515 }
 0x3f3   :  { %3560 = vpow2.f32 %v519_v12  ;;  %v518_v14 = vsub.f32 %v509_v8, %v516_v13  ;;  %v1012_v12 = vmul.f32 %v4046_v6, %v3979_v55 }
 0x3f5   :  { %v521_v15 = vmul.f32 1.442695, %v518_v14 }
 0x3f7   :  { %3562 = vpow2.f32 %v521_v15 }
 0x3fd   :  { %v3561_v16 = vpop.eup %3560 }
 0x3fe   :  { %v523_v17 = vsel %vm510_vm6, %v3561_v16, 0.0 }
 0x3ff   :  { %524 = vadd.xlane.f32.xlu0 %v523_v17 }
 0x401   :  { %v3563_v18 = vpop.eup %3562 }
 0x402   :  { %v526_v19 = vsel %vm510_vm6, %v3563_v18, 0.0 }
 0x403   :  { %527 = vadd.xlane.f32.xlu1 %v526_v19 }
 0x48c   :  { %v525_v20 = vpop.xlane.xlu0 %524 }
 0x48d   :  { %3564 = vrcp.f32 %v525_v20 }
 0x490   :  { %v528_v21 = vpop.xlane.xlu1 %527 }
 0x491   :  { %3566 = vrcp.f32 %v528_v21 }
 0x497   :  { %v3565_v22 = vpop.eup %3564 }
 0x498   :  { %v531_v23 = vmul.f32 %v3565_v22, %v3561_v16 }
 0x49a   :  { %3106 = vmatmul.mubr.msk.f32.vlgmr.msra.gmra.mrb[8].mxu0 %vm510_vm6, %v531_v23 }
 0x49b   :  { %v3567_v24 = vpop.eup %3566  ;;  %3109 = vmatpush3.msra.mxu0 %v3977_v54  ;;  %3110 = vmatprep.mubr.msk.f32.mxu0 %vm3790_vm1, %v3789_v1 }
 0x49c   :  { %v532_v25 = vmul.f32 %v3567_v24, %v3563_v18  ;;  %3113 = vmatprep.subr.mxu0 %v3789_v1 }
 0x49e   :  { %3111 = vmatmul.mubr.msk.f32.vlgmr.msra.gmra.mrb[10].mxu0 %vm510_vm6, %v532_v25 }
 0x49f   :  { %3115 = vmatprep.mubr.msk.f32.mxu0 %vm3790_vm1, %v3789_v1 }
 0x4a2   :  { %3114 = vmatpush3.xpose.msra.mxu0 %v688_v27 }
 0x4a3   :  { %3118 = vmatprep.subr.mxu0 %v3789_v1 }
 0x4a5   :  { %3116 = vmatmul.mubr.f32.vlgmr.msra.gmra.mrb[12].mxu0 %v3969_v40 }
 0x4a6   :  { %3119 = vmatpush3.xpose.msra.mxu0 %v689_v28  ;;  %3120 = vmatprep.mubr.msk.f32.mxu0 %vm3790_vm1, %v3789_v1 }
 0x4a7   :  { %3128 = vmatprep.subr.mxu0 %v3789_v1 }
 0x4a9   :  { %3121 = vmatmul.mubr.f32.vlgmr.msra.gmra.mrb[14].mxu0 %v3975_v53 }
 0x4aa   :  { %3129 = vmatpush3.msra.mxu0 %v3977_v54  ;;  %3130 = vmatprep.mubr.msk.f32.mxu0 %vm3790_vm1, %v3789_v1 }
 0x4ab   :  { %3138 = vmatprep.subr.mxu0 %v3789_v1 }
 0x56d   :  { %v602_v29 = vpop.f32.mrb[8].mxu0 }
 0x56e   :  { %v3107_v30 = vpop.f32.mrb[9].mxu0  ;;  %v679_v14 = vmul.f32 %v3967_v37, %v602_v29 }
 0x571   :  { %v4035_v31 = vpop.f32.mrb[10].mxu0 }
 0x572   :  { %v3112_v32 = vpop.f32.mrb[11].mxu0  ;;  %v680_v20 = vmul.f32 %v3967_v37, %v4035_v31 }
 0x578   :  { %v756_v33 = vpop.f32.mrb[12].mxu0 }
 0x579   :  { %v830_v34 = vmul.f32 0.10540926, %v756_v33  ;;  %v3117_v36 = vpop.f32.mrb[13].mxu0 }
 0x57b   :  { %v832_v42 = vadd.f32 %v830_v34, %v4000_v60 }
 0x57c   :  { %v826_v43 = vpop.f32.mrb[14].mxu0 }
 0x57d   :  { %v831_v44 = vmul.f32 0.10540926, %v826_v43  ;;  %v3122_v0 = vpop.f32.mrb[15].mxu0  ;;  %v834_v45 = vsel %vm510_vm6, %v832_v42, -inf }
 0x57e   :  { %835 = vmax.xlane.f32.xlu0 %v834_v45 }
 0x57f   :  { %v833_v46 = vadd.f32 %v831_v44, %v4000_v60 }
 0x581   :  { %v837_v47 = vsel %vm510_vm6, %v833_v46, -inf }
 0x582   :  { %838 = vmax.xlane.f32.xlu1 %v837_v47 }
 0x60b   :  { %v836_v48 = vpop.xlane.xlu0 %835 }
 0x60c   :  { %v840_v49 = vsub.f32 %v832_v42, %v836_v48 }
 0x60e   :  { %v842_v50 = vmul.f32 1.442695, %v840_v49  ;;  %v4088_v49 = vsel %vm1331_vm15, 1.0, %v3789_v1 }
 0x60f   :  { %v839_v52 = vpop.xlane.xlu1 %838 }
 0x610   :  { %3568 = vpow2.f32 %v842_v50  ;;  %v841_v57 = vsub.f32 %v833_v46, %v839_v52 }
 0x612   :  { %v844_v58 = vmul.f32 1.442695, %v841_v57  ;;  %v1334_v57 = vmul.f32 %v4088_v49, %v3971_v51 }
 0x614   :  { %3570 = vpow2.f32 %v844_v58 }
 0x61a   :  { %v3569_v59 = vpop.eup %3568 }
 0x61b   :  { %v846_v61 = vsel %vm510_vm6, %v3569_v59, 0.0 }
 0x61c   :  { %847 = vadd.xlane.f32.xlu0 %v846_v61  ;;  %v1335_v61 = vmul.f32 %v4088_v49, %v3979_v55 }
 0x61e   :  { %v3571_v62 = vpop.eup %3570 }
 0x61f   :  { %v849_v63 = vsel %vm510_vm6, %v3571_v62, 0.0 }
 0x620   :  { %850 = vadd.xlane.f32.xlu1 %v849_v63 }
 0x6a9   :  { %v848_v4 = vpop.xlane.xlu0 %847 }
 0x6aa   :  { %3572 = vrcp.f32 %v848_v4 }
 0x6ad   :  { %v851_v5 = vpop.xlane.xlu1 %850 }
 0x6ae   :  { %3574 = vrcp.f32 %v851_v5 }
 0x6b4   :  { %v3573_v7 = vpop.eup %3572 }
 0x6b5   :  { %v854_v8 = vmul.f32 %v3573_v7, %v3569_v59 }
 0x6b7   :  { %3126 = vmatmul.mubr.msk.f32.vlgmr.msra.gmra.mrb[2].mxu1 %vm510_vm6, %v854_v8 }
 0x6b8   :  { %v3575_v10 = vpop.eup %3574  ;;  %3134 = vmatpush3.xpose.msra.mxu1 %v1011_v9  ;;  %3135 = vmatprep.mubr.msk.f32.mxu1 %vm3790_vm1, %v3789_v1 }
 0x6b9   :  { %v855_v11 = vmul.f32 %v3575_v10, %v3571_v62  ;;  %3143 = vmatprep.subr.mxu1 %v3789_v1 }
 0x6bb   :  { %3131 = vmatmul.mubr.msk.f32.vlgmr.msra.gmra.mrb[16].mxu0 %vm510_vm6, %v855_v11  ;;  %3136 = vmatmul.mubr.f32.vlgmr.msra.gmra.mrb[4].mxu1 %v3969_v40 }
 0x6bc   :  { %3139 = vmatpush3.xpose.msra.mxu0 %v1012_v12  ;;  %3144 = vmatpush3.msra.mxu1 %v3981_v56 }
 0x6bd   :  { %3140 = vmatprep.mubr.msk.f32.mxu0 %vm3790_vm1, %v3789_v1  ;;  %3148 = vmatprep.subr.mxu0 %v3789_v1 }
 0x6be   :  { %3145 = vmatprep.mubr.msk.f32.mxu1 %vm3790_vm1, %v3789_v1  ;;  %3153 = vmatprep.subr.mxu1 %v3789_v1 }
 0x6bf   :  { %3141 = vmatmul.mubr.f32.vlgmr.msra.gmra.mrb[18].mxu0 %v3975_v53 }
 0x6c0   :  { %3149 = vmatpush3.msra.mxu0 %v3977_v54  ;;  %3150 = vmatprep.mubr.msk.f32.mxu0 %vm3790_vm1, %v3789_v1 }
 0x6c1   :  { %3158 = vmatprep.subr.mxu0 %v3789_v1 }
 0x78a   :  { %v925_v13 = vpop.f32.mrb[2].mxu1 }
 0x78b   :  { %v1002_v15 = vmul.f32 %v4016_v26, %v925_v13  ;;  %v3127_v16 = vpop.f32.mrb[3].mxu1 }
 0x78d   :  { %v4072_v17 = vadd.f32 %v1002_v15, %v679_v14 }
 0x78e   :  { %v998_v18 = vpop.f32.mrb[16].mxu0  ;;  %v1079_v19 = vpop.f32.mrb[4].mxu1 }
 0x78f   :  { %v1003_v21 = vmul.f32 %v4016_v26, %v998_v18  ;;  %v1153_v22 = vmul.f32 0.10540926, %v1079_v19  ;;  %v3132_v23 = vpop.f32.mrb[17].mxu0  ;;  %v3137_v24 = vpop.f32.mrb[5].mxu1 }
 0x791   :  { %v4077_v25 = vadd.f32 %v1003_v21, %v680_v20  ;;  %v1155_v27 = vadd.f32 %v1153_v22, %v4000_v60 }
 0x792   :  { %v1149_v28 = vpop.f32.mrb[18].mxu0 }
 0x793   :  { %v1154_v29 = vmul.f32 0.10540926, %v1149_v28  ;;  %v3142_v30 = vpop.f32.mrb[19].mxu0  ;;  %v1157_v32 = vsel %vm510_vm6, %v1155_v27, -inf }
 0x794   :  { %1158 = vmax.xlane.f32.xlu0 %v1157_v32 }
 0x795   :  { %v1156_v33 = vadd.f32 %v1154_v29, %v4000_v60 }
 0x797   :  { %v1160_v34 = vsel %vm510_vm6, %v1156_v33, -inf }
 0x798   :  { %1161 = vmax.xlane.f32.xlu1 %v1160_v34  ;;  %v4129_v34 = vsel %vm1654_vm4, 1.0, %v3789_v1 }
 0x821   :  { %v1159_v37 = vpop.xlane.xlu0 %1158 }
 0x822   :  { %v1163_v26 = vsub.f32 %v1155_v27, %v1159_v37 }
 0x824   :  { %v1165_v31 = vmul.f32 1.442695, %v1163_v26 }
 0x825   :  { %v1162_v36 = vpop.xlane.xlu1 %1161 }
 0x826   :  { %3576 = vpow2.f32 %v1165_v31  ;;  %v1164_v42 = vsub.f32 %v1156_v33, %v1162_v36  ;;  %v1657_v31 = vmul.f32 %v4129_v34, %v3971_v51 }
 0x828   :  { %v1167_v43 = vmul.f32 1.442695, %v1164_v42 }
 0x82a   :  { %3578 = vpow2.f32 %v1167_v43  ;;  %v1658_v43 = vmul.f32 %v4129_v34, %v3979_v55 }
 0x830   :  { %v3577_v44 = vpop.eup %3576 }
 0x831   :  { %v1169_v0 = vsel %vm510_vm6, %v3577_v44, 0.0 }
 0x832   :  { %1170 = vadd.xlane.f32.xlu0 %v1169_v0 }
 0x834   :  { %v3579_v45 = vpop.eup %3578 }
 0x835   :  { %v1172_v46 = vsel %vm510_vm6, %v3579_v45, 0.0 }
 0x836   :  { %1173 = vadd.xlane.f32.xlu1 %v1172_v46 }
 0x8bf   :  { %v1171_v47 = vpop.xlane.xlu0 %1170 }
 0x8c0   :  { %3580 = vrcp.f32 %v1171_v47 }
 0x8c3   :  { %v1174_v48 = vpop.xlane.xlu1 %1173 }
 0x8c4   :  { %3582 = vrcp.f32 %v1174_v48 }
 0x8ca   :  { %v3581_v50 = vpop.eup %3580 }
 0x8cb   :  { %v1177_v52 = vmul.f32 %v3581_v50, %v3577_v44 }
 0x8cd   :  { %3146 = vmatmul.mubr.msk.f32.vlgmr.msra.gmra.mrb[6].mxu1 %vm510_vm6, %v1177_v52 }
 0x8ce   :  { %v3583_v58 = vpop.eup %3582  ;;  %3154 = vmatpush3.xpose.msra.mxu1 %v1334_v57  ;;  %3155 = vmatprep.mubr.msk.f32.mxu1 %vm3790_vm1, %v3789_v1 }
 0x8cf   :  { %v1178_v59 = vmul.f32 %v3583_v58, %v3579_v45  ;;  %3163 = vmatprep.subr.mxu1 %v3789_v1 }
 0x8d1   :  { %3151 = vmatmul.mubr.msk.f32.vlgmr.msra.gmra.mrb[20].mxu0 %vm510_vm6, %v1178_v59  ;;  %3156 = vmatmul.mubr.f32.vlgmr.msra.gmra.mrb[8].mxu1 %v3969_v40 }
 0x8d2   :  { %3159 = vmatpush3.xpose.msra.mxu0 %v1335_v61  ;;  %3164 = vmatpush3.msra.mxu1 %v3981_v56 }
 0x8d3   :  { %3160 = vmatprep.mubr.msk.f32.mxu0 %vm3790_vm1, %v3789_v1  ;;  %3168 = vmatprep.subr.mxu0 %v3789_v1 }
 0x8d4   :  { %3165 = vmatprep.mubr.msk.f32.mxu1 %vm3790_vm1, %v3789_v1  ;;  %3173 = vmatprep.subr.mxu1 %v3789_v1 }
 0x8d5   :  { %3161 = vmatmul.mubr.f32.vlgmr.msra.gmra.mrb[22].mxu0 %v3975_v53 }
 0x8d6   :  { %3169 = vmatpush3.msra.mxu0 %v3977_v54  ;;  %3170 = vmatprep.mubr.msk.f32.mxu0 %vm3790_vm1, %v3789_v1 }
 0x8d7   :  { %3178 = vmatprep.subr.mxu0 %v3789_v1 }
 0x9a0   :  { %v1248_v62 = vpop.f32.mrb[6].mxu1 }
 0x9a1   :  { %v1325_v63 = vmul.f32 %v4046_v6, %v1248_v62  ;;  %v3147_v4 = vpop.f32.mrb[7].mxu1 }
 0x9a3   :  { %v4114_v5 = vadd.f32 %v1325_v63, %v4072_v17 }
 0x9a4   :  { %v1321_v7 = vpop.f32.mrb[20].mxu0  ;;  %v1402_v8 = vpop.f32.mrb[8].mxu1 }
 0x9a5   :  { %v1326_v9 = vmul.f32 %v4046_v6, %v1321_v7  ;;  %v1476_v10 = vmul.f32 0.10540926, %v1402_v8  ;;  %v3152_v11 = vpop.f32.mrb[21].mxu0  ;;  %v3157_v12 = vpop.f32.mrb[9].mxu1 }
 0x9a7   :  { %v4118_v13 = vadd.f32 %v1326_v9, %v4077_v25  ;;  %v1478_v14 = vadd.f32 %v1476_v10, %v4000_v60 }
 0x9a8   :  { %v1472_v15 = vpop.f32.mrb[22].mxu0 }
 0x9a9   :  { %v1477_v16 = vmul.f32 0.10540926, %v1472_v15  ;;  %v3162_v18 = vpop.f32.mrb[23].mxu0  ;;  %v1480_v19 = vsel %vm510_vm6, %v1478_v14, -inf }
 0x9aa   :  { %1481 = vmax.xlane.f32.xlu0 %v1480_v19 }
 0x9ab   :  { %v1479_v17 = vadd.f32 %v1477_v16, %v4000_v60 }
 0x9ad   :  { %v1483_v20 = vsel %vm510_vm6, %v1479_v17, -inf }
 0x9ae   :  { %1484 = vmax.xlane.f32.xlu1 %v1483_v20  ;;  %v4167_v20 = vsel %vm1976_vm7, 1.0, %v3789_v1 }
 0x9af   :  { %v1980_v2 = vmul.f32 %v4167_v20, %v3979_v55 }
 0xa37   :  { %v1482_v6 = vpop.xlane.xlu0 %1481 }
 0xa38   :  { %v1486_v21 = vsub.f32 %v1478_v14, %v1482_v6 }
 0xa3a   :  { %v1488_v22 = vmul.f32 1.442695, %v1486_v21 }
 0xa3b   :  { %v1485_v23 = vpop.xlane.xlu1 %1484 }
 0xa3c   :  { %3584 = vpow2.f32 %v1488_v22  ;;  %v1487_v24 = vsub.f32 %v1479_v17, %v1485_v23  ;;  %v1979_v22 = vmul.f32 %v4167_v20, %v3971_v51 }
 0xa3e   :  { %v1490_v25 = vmul.f32 1.442695, %v1487_v24 }
 0xa40   :  { %3586 = vpow2.f32 %v1490_v25 }
 0xa46   :  { %v3585_v27 = vpop.eup %3584 }
 0xa47   :  { %v1492_v28 = vsel %vm510_vm6, %v3585_v27, 0.0 }
 0xa48   :  { %1493 = vadd.xlane.f32.xlu0 %v1492_v28 }
 0xa4a   :  { %v3587_v29 = vpop.eup %3586 }
 0xa4b   :  { %v1495_v30 = vsel %vm510_vm6, %v3587_v29, 0.0 }
 0xa4c   :  { %1496 = vadd.xlane.f32.xlu1 %v1495_v30 }
 0xad5   :  { %v1494_v32 = vpop.xlane.xlu0 %1493 }
 0xad6   :  { %3588 = vrcp.f32 %v1494_v32 }
 0xad9   :  { %v1497_v33 = vpop.xlane.xlu1 %1496 }
 0xada   :  { %3590 = vrcp.f32 %v1497_v33 }
 0xae0   :  { %v3589_v37 = vpop.eup %3588 }
 0xae1   :  { %v1500_v26 = vmul.f32 %v3589_v37, %v3585_v27 }
 0xae3   :  { %3166 = vmatmul.mubr.msk.f32.vlgmr.msra.gmra.mrb[10].mxu1 %vm510_vm6, %v1500_v26 }
 0xae4   :  { %v3591_v36 = vpop.eup %3590  ;;  %3174 = vmatpush3.xpose.msra.mxu1 %v1657_v31  ;;  %3175 = vmatprep.mubr.msk.f32.mxu1 %vm3790_vm1, %v3789_v1 }
 0xae5   :  { %v1501_v42 = vmul.f32 %v3591_v36, %v3587_v29  ;;  %3183 = vmatprep.subr.mxu1 %v3789_v1 }
 0xae7   :  { %3171 = vmatmul.mubr.msk.f32.vlgmr.msra.gmra.mrb[24].mxu0 %vm510_vm6, %v1501_v42  ;;  %3176 = vmatmul.mubr.f32.vlgmr.msra.gmra.mrb[12].mxu1 %v3969_v40 }
 0xae8   :  { %3179 = vmatpush3.xpose.msra.mxu0 %v1658_v43  ;;  %3184 = vmatpush3.msra.mxu1 %v3981_v56 }
 0xae9   :  { %3180 = vmatprep.mubr.msk.f32.mxu0 %vm3790_vm1, %v3789_v1  ;;  %3188 = vmatprep.subr.mxu0 %v3789_v1 }
 0xaea   :  { %3185 = vmatprep.mubr.msk.f32.mxu1 %vm3790_vm1, %v3789_v1  ;;  %3193 = vmatprep.subr.mxu1 %v3789_v1 }
 0xaeb   :  { %3181 = vmatmul.mubr.f32.vlgmr.msra.gmra.mrb[26].mxu0 %v3975_v53 }
 0xaec   :  { %3189 = vmatpush3.msra.mxu0 %v3977_v54  ;;  %3190 = vmatprep.mubr.msk.f32.mxu0 %vm3790_vm1, %v3789_v1 }
 0xaed   :  { %3198 = vmatprep.subr.mxu0 %v3789_v1 }
 0xbb6   :  { %v1571_v44 = vpop.f32.mrb[10].mxu1 }
 0xbb7   :  { %v1648_v0 = vmul.f32 %v4088_v49, %v1571_v44  ;;  %v3167_v45 = vpop.f32.mrb[11].mxu1 }
 0xbb9   :  { %v1650_v46 = vadd.f32 %v1648_v0, %v4114_v5 }
 0xbba   :  { %v1644_v47 = vpop.f32.mrb[24].mxu0  ;;  %v1725_v48 = vpop.f32.mrb[12].mxu1 }
 0xbbb   :  { %v1649_v50 = vmul.f32 %v4088_v49, %v1644_v47  ;;  %v1799_v52 = vmul.f32 0.10540926, %v1725_v48  ;;  %v3172_v57 = vpop.f32.mrb[25].mxu0  ;;  %v3177_v58 = vpop.f32.mrb[13].mxu1 }
 0xbbc   :  { %v2298_v57 = vld [vmem:[#allocation8 + $0x8] sm:$0xff] }
 0xbbd   :  { %v1651_v59 = vadd.f32 %v1649_v50, %v4118_v13  ;;  %v1801_v61 = vadd.f32 %v1799_v52, %v4000_v60 }
 0xbbe   :  { %v1795_v62 = vpop.f32.mrb[26].mxu0 }
 0xbbf   :  { %v1800_v63 = vmul.f32 0.10540926, %v1795_v62  ;;  %v3182_v4 = vpop.f32.mrb[27].mxu0  ;;  %v1803_v7 = vsel %vm510_vm6, %v1801_v61, -inf  ;;  %v2299_v62 = vld [vmem:[#allocation8 + $0x10] sm:$0xff] }
 0xbc0   :  { %1804 = vmax.xlane.f32.xlu0 %v1803_v7 }
 0xbc1   :  { %v1802_v8 = vadd.f32 %v1800_v63, %v4000_v60  ;;  %v2300_v63 = vld [vmem:[#allocation8 + $0x18] sm:$0xff] }
 0xbc3   :  { %v1806_v5 = vsel %vm510_vm6, %v1802_v8, -inf }
 0xbc4   :  { %1807 = vmax.xlane.f32.xlu1 %v1806_v5  ;;  %v2301_v5 = vld [vmem:[#allocation8 + $0x20] sm:$0xff] }
 0xc4d   :  { %v1805_v9 = vpop.xlane.xlu0 %1804 }
 0xc4e   :  { %v1809_v49 = vsub.f32 %v1801_v61, %v1805_v9  ;;  %v2302_v9 = vld [vmem:[#allocation8 + $0x28] sm:$0xff] }
 0xc50   :  { %v1811_v10 = vmul.f32 1.442695, %v1809_v49 }
 0xc51   :  { %v1808_v11 = vpop.xlane.xlu1 %1807 }
 0xc52   :  { %3592 = vpow2.f32 %v1811_v10  ;;  %v1810_v12 = vsub.f32 %v1802_v8, %v1808_v11  ;;  %v3386_v8 = vpack.c.bf16 %v2300_v63, %v2299_v62  ;;  %v3390_v11 = vpack.c.bf16 %v2302_v9, %v2301_v5  ;;  %v2440_v62 = vld [vmem:[#allocation10 + $0x40] sm:$0xff]  ;;  %v2443_v63 = vld [vmem:[#allocation10 + $0x58] sm:$0xff] }
 0xc53   :  { %v2448_v5 = vld [vmem:[#allocation10 + $0x80] sm:$0xff] }
 0xc54   :  { %v1813_v13 = vmul.f32 1.442695, %v1810_v12  ;;  %v2303_v12 = vld [vmem:[#allocation8 + $0x30] sm:$0xff]  ;;  %v2444_v9 = vld [vmem:[#allocation10 + $0x60] sm:$0xff] }
 0xc56   :  { %3594 = vpow2.f32 %v1813_v13  ;;  %v2304_v13 = vld [vmem:[#allocation8 + $0x38] sm:$0xff] }
 0xc5c   :  { %v3593_v14 = vpop.eup %3592 }
 0xc5d   :  { %v1815_v15 = vsel %vm510_vm6, %v3593_v14, 0.0 }
 0xc5e   :  { %1816 = vadd.xlane.f32.xlu0 %v1815_v15  ;;  %v2305_v15 = vld [vmem:[#allocation8 + $0x40] sm:$0xff] }
 0xc60   :  { %v3595_v16 = vpop.eup %3594 }
 0xc61   :  { %v1818_v18 = vsel %vm510_vm6, %v3595_v16, 0.0 }
 0xc62   :  { %1819 = vadd.xlane.f32.xlu1 %v1818_v18 }
 0xceb   :  { %v1817_v19 = vpop.xlane.xlu0 %1816 }
 0xcec   :  { %3596 = vrcp.f32 %v1817_v19  ;;  %v2307_v19 = vld [vmem:[#allocation8 + $0x50] sm:$0xff] }
 0xcef   :  { %v1820_v17 = vpop.xlane.xlu1 %1819 }
 0xcf0   :  { %3598 = vrcp.f32 %v1820_v17  ;;  %v2308_v17 = vld [vmem:[#allocation8 + $0x58] sm:$0xff] }
 0xcf6   :  { %v3597_v6 = vpop.eup %3596 }
 0xcf7   :  { %v1823_v21 = vmul.f32 %v3597_v6, %v3593_v14  ;;  %v3394_v14 = vpack.c.bf16 %v2304_v13, %v2303_v12  ;;  %v3402_v6 = vpack.c.bf16 %v2308_v17, %v2307_v19  ;;  %v2449_v12 = vld [vmem:[#allocation10 + $0x88] sm:$0xff] }
 0xcf9   :  { %3186 = vmatmul.mubr.msk.f32.vlgmr.msra.gmra.mrb[14].mxu1 %vm510_vm6, %v1823_v21  ;;  %v2309_v21 = vld [vmem:[#allocation8 + $0x60] sm:$0xff] }
 0xcfa   :  { %v3599_v23 = vpop.eup %3598  ;;  %3194 = vmatpush3.xpose.msra.mxu1 %v1979_v22  ;;  %3195 = vmatprep.mubr.msk.f32.mxu1 %vm3790_vm1, %v3789_v1  ;;  %v2310_v22 = vld [vmem:[#allocation8 + $0x68] sm:$0xff] }
 0xcfb   :  { %v1824_v24 = vmul.f32 %v3599_v23, %v3595_v16  ;;  %3203 = vmatprep.subr.mxu1 %v3789_v1  ;;  %v2306_v16 = vld [vmem:[#allocation8 + $0x48] sm:$0xff]  ;;  %v3406_v23 = vpack.c.bf16 %v2310_v22, %v2309_v21 }
 0xcfc   :  { %v3398_v18 = vpack.c.bf16 %v2306_v16, %v2305_v15 }
 0xcfd   :  { %3191 = vmatmul.mubr.msk.f32.vlgmr.msra.gmra.mrb[28].mxu0 %vm510_vm6, %v1824_v24  ;;  %3196 = vmatmul.mubr.f32.vlgmr.msra.gmra.mrb[16].mxu1 %v3969_v40  ;;  %v2311_v24 = vld [vmem:[#allocation8 + $0x70] sm:$0xff] }
 0xcfe   :  { %3199 = vmatpush3.xpose.msra.mxu0 %v1980_v2  ;;  %3204 = vmatpush3.msra.mxu1 %v3981_v56  ;;  %v2312_v2 = vld [vmem:[#allocation8 + $0x78] sm:$0xff] }
 0xcff   :  { %3200 = vmatprep.mubr.msk.f32.mxu0 %vm3790_vm1, %v3789_v1  ;;  %3208 = vmatprep.subr.mxu0 %v3789_v1 }
 0xd00   :  { %3205 = vmatprep.mubr.msk.f32.mxu1 %vm3790_vm1, %v3789_v1 }
 0xd01   :  { %3201 = vmatmul.mubr.f32.vlgmr.msra.gmra.mrb[30].mxu0 %v3975_v53 }
 0xd02   :  { %3209 = vmatpush3.msra.mxu0 %v3977_v54  ;;  %3210 = vmatprep.mubr.msk.f32.mxu0 %vm3790_vm1, %v3789_v1 }
 0xdcc   :  { %v1894_v51 = vpop.f32.mrb[14].mxu1 }
 0xdcd   :  { %v1971_v40 = vmul.f32 %v4129_v34, %v1894_v51  ;;  %v3187_v55 = vpop.f32.mrb[15].mxu1  ;;  %v3410_v51 = vpack.c.bf16 %v2312_v2, %v2311_v24  ;;  %v2451_v2 = vld [vmem:[#allocation10 + $0x98] sm:$0xff] }
 0xdcf   :  { %v4190_v56 = vadd.f32 %v1971_v40, %v1650_v46 }
 0xdd0   :  { %v1967_v25 = vpop.f32.mrb[28].mxu0  ;;  %v2047_v27 = vpop.f32.mrb[16].mxu1 }
 0xdd1   :  { %v1972_v28 = vmul.f32 %v4129_v34, %v1967_v25  ;;  %v2121_v29 = vmul.f32 0.10540926, %v2047_v27  ;;  %v3192_v30 = vpop.f32.mrb[29].mxu0  ;;  %v3197_v32 = vpop.f32.mrb[17].mxu1 }
 0xdd3   :  { %v4193_v33 = vadd.f32 %v1972_v28, %v1651_v59  ;;  %v2123_v53 = vadd.f32 %v2121_v29, %v4000_v60 }
 0xdd4   :  { %v2117_v54 = vpop.f32.mrb[30].mxu0 }
 0xdd5   :  { %v2122_v37 = vmul.f32 0.10540926, %v2117_v54  ;;  %v3202_v26 = vpop.f32.mrb[31].mxu0  ;;  %v2125_v31 = vsel %vm510_vm6, %v2123_v53, -inf }
 0xdd6   :  { %2126 = vmax.xlane.f32.xlu0 %v2125_v31 }
 0xdd7   :  { %v2124_v36 = vadd.f32 %v2122_v37, %v4000_v60  ;;  %v2297_v60 = vld [vmem:[#allocation8] sm:$0xff] }
 0xdd8   :  { %v3382_v58 = vpack.c.bf16 %v2298_v57, %v2297_v60  ;;  %v2439_v60 = vld [vmem:[#allocation10 + $0x38] sm:$0xff]  ;;  %v2442_v57 = vld [vmem:[#allocation10 + $0x50] sm:$0xff] }
 0xdd9   :  { %v2128_v42 = vsel %vm510_vm6, %v2124_v36, -inf }
 0xdda   :  { %2129 = vmax.xlane.f32.xlu1 %v2128_v42  ;;  %3383 = vmatprep.subr.bf16.mxu1 %v3382_v58  ;;  %v3612_v42 = vld [vmem:[#allocation2 + $0x8] sm:$0xff] }
 0xe63   :  { %v2127_v43 = vpop.xlane.xlu0 %2126 }
 0xe64   :  { %v2131_v34 = vsub.f32 %v2123_v53, %v2127_v43  ;;  %v2315_v53 = vsub.s32 4, %v3946_v35 }
 0xe66   :  { %v2133_v44 = vmul.f32 1.442695, %v2131_v34  ;;  %v2316_v54 = vrot.slane %v3949_v39, %v2315_v53  ;;  %v2436_v39 = vld [vmem:[#allocation10 + $0x20] sm:$0xff] }
 0xe67   :  { %v2130_v0 = vpop.xlane.xlu1 %2129 }
 0xe68   :  { %3600 = vpow2.f32 %v2133_v44  ;;  %v2132_v45 = vsub.f32 %v2124_v36, %v2130_v0  ;;  %v2433_v44 = vld [vmem:[#allocation10 + $0x8] sm:$0xff]  ;;  %v2432_v0 = vld [vmem:[#allocation10] sm:$0xff] }
 0xe6a   :  { %v2135_v46 = vmul.f32 1.442695, %v2132_v45  ;;  %v3414_v45 = vpack.c.bf16 %v2436_v39, %v2433_v44  ;;  %v2462_v44 = vld [vmem:[#allocation10 + $0xf0] sm:$0xff]  ;;  %v2465_v39 = vld [vmem:[#allocation10 + $0x108] sm:$0xff] }
 0xe6c   :  { %3602 = vpow2.f32 %v2135_v46  ;;  %v2435_v46 = vld [vmem:[#allocation10 + $0x18] sm:$0xff]  ;;  %3415 = vmatprep.subr.bf16.mxu0 %v3414_v45  ;;  %v3436_v45 = vpack.c.bf16 %v2465_v39, %v2462_v44  ;;  %v2657_v39 = vld [vmem:[#allocation11 + $0x10] sm:$0xff] }
 0xe72   :  { %v3601_v47 = vpop.eup %3600 }
 0xe73   :  { %v2137_v48 = vsel %vm510_vm6, %v3601_v47, 0.0 }
 0xe74   :  { %2138 = vadd.xlane.f32.xlu0 %v2137_v48  ;;  %v2437_v48 = vld [vmem:[#allocation10 + $0x28] sm:$0xff] }
 0xe76   :  { %v3603_v50 = vpop.eup %3602 }
 0xe77   :  { %v2140_v52 = vsel %vm510_vm6, %v3603_v50, 0.0 }
 0xe78   :  { %2141 = vadd.xlane.f32.xlu1 %v2140_v52 }
 0xf01   :  { %v2139_v59 = vpop.xlane.xlu0 %2138 }
 0xf02   :  { %3604 = vrcp.f32 %v2139_v59  ;;  %v3418_v59 = vpack.c.bf16 %v2442_v57, %v2439_v60  ;;  %v2468_v60 = vld [vmem:[#allocation10 + $0x120] sm:$0xff]  ;;  %v2471_v57 = vld [vmem:[#allocation10 + $0x138] sm:$0xff] }
 0xf05   :  { %v2142_v61 = vpop.xlane.xlu1 %2141 }
 0xf06   :  { %3606 = vrcp.f32 %v2142_v61  ;;  %v2441_v61 = vld [vmem:[#allocation10 + $0x48] sm:$0xff] }
 0xf0c   :  { %v3605_v4 = vpop.eup %3604 }
 0xf0d   :  { %v2145_v7 = vmul.f32 %v3605_v4, %v3601_v47  ;;  %v2434_v47 = vld [vmem:[#allocation10 + $0x10] sm:$0xff] }
 0xf0e   :  { %v3446_v52 = vpack.c.bf16 %v2437_v48, %v2434_v47  ;;  %v2469_v47 = vld [vmem:[#allocation10 + $0x128] sm:$0xff]  ;;  %v2472_v48 = vld [vmem:[#allocation10 + $0x140] sm:$0xff] }
 0xf0f   :  { %3206 = vmatmul.mubr.msk.f32.vlgmr.msra.gmra.mrb[18].mxu1 %vm510_vm6, %v2145_v7  ;;  %v3450_v7 = vpack.c.bf16 %v2443_v63, %v2440_v62  ;;  %v2478_v62 = vld [vmem:[#allocation10 + $0x170] sm:$0xff] }
 0xf10   :  { %v3607_v49 = vpop.eup %3606  ;;  %3385 = vmatpush3.bf16.msra.mxu1 %v3382_v58  ;;  %v2438_v58 = vld [vmem:[#allocation10 + $0x30] sm:$0xff] }
 0xf11   :  { %v2146_v10 = vmul.f32 %v3607_v49, %v3603_v50  ;;  %3387 = vmatprep.subr.bf16.mxu1 %v3386_v8  ;;  %v3416_v50 = vpack.c.bf16 %v2435_v46, %v2432_v0  ;;  %v3420_v4 = vpack.c.bf16 %v2441_v61, %v2438_v58  ;;  %v2464_v0 = vld [vmem:[#allocation10 + $0x100] sm:$0xff]  ;;  %v2467_v46 = vld [vmem:[#allocation10 + $0x118] sm:$0xff]  ;;  %v2470_v58 = vld [vmem:[#allocation10 + $0x130] sm:$0xff] }
 0xf12   :  { %v2475_v61 = vld [vmem:[#allocation10 + $0x158] sm:$0xff] }
 0xf13   :  { %3211 = vmatmul.mubr.msk.f32.vlgmr.msra.gmra.mrb[32].mxu0 %vm510_vm6, %v2146_v10  ;;  %v2447_v10 = vld [vmem:[#allocation10 + $0x78] sm:$0xff] }
 0xf14   :  { %3389 = vmatpush3.bf16.msra.mxu1 %v3386_v8  ;;  %2561 = vmatprep.mubr.f32.mxu0 %v3789_v1  ;;  %v2445_v8 = vld [vmem:[#allocation10 + $0x68] sm:$0xff] }
 0xf15   :  { %3391 = vmatprep.subr.bf16.mxu1 %v3390_v11  ;;  %3417 = vmatpush1.bf16.msra.mxu0 %v3416_v50  ;;  %v3422_v49 = vpack.c.bf16 %v2448_v5, %v2445_v8  ;;  %v3466_v50 = vpack.c.bf16 %v2467_v46, %v2464_v0  ;;  %v2479_v8 = vld [vmem:[#allocation10 + $0x178] sm:$0xff]  ;;  %v3442_v5 = vpack.c.bf16 %v2478_v62, %v2475_v61  ;;  %v2691_v46 = vld [vmem:[#allocation11 + $0x120] sm:$0xff]  ;;  %v2693_v61 = vld [vmem:[#allocation11 + $0x130] sm:$0xff] }
 0xf16   :  { %3419 = vmatprep.subr.bf16.mxu0 %v3418_v59  ;;  %v2473_v59 = vld [vmem:[#allocation10 + $0x148] sm:$0xff]  ;;  %v2658_v0 = vld [vmem:[#allocation11 + $0x18] sm:$0xff] }
 0xf17   :  { %v3470_v63 = vpack.c.bf16 %v2473_v59, %v2470_v58  ;;  %v2677_v58 = vld [vmem:[#allocation11 + $0xb0] sm:$0xff]  ;;  %v2678_v59 = vld [vmem:[#allocation11 + $0xb8] sm:$0xff] }
 0xf18   :  { %3393 = vmatpush3.bf16.msra.mxu1 %v3390_v11  ;;  %v2446_v11 = vld [vmem:[#allocation10 + $0x70] sm:$0xff]  ;;  %v2694_v62 = vld [vmem:[#allocation11 + $0x138] sm:$0xff] }
 0xf19   :  { %3395 = vmatprep.subr.bf16.mxu1 %v3394_v14  ;;  %v3454_v13 = vpack.c.bf16 %v2449_v12, %v2446_v11  ;;  %3421 = vmatpush1.bf16.msra.mxu0 %v3420_v4  ;;  %v3440_v4 = vpack.c.bf16 %v2471_v57, %v2468_v60  ;;  %v2671_v12 = vld [vmem:[#allocation11 + $0x80] sm:$0xff]  ;;  %v2660_v60 = vld [vmem:[#allocation11 + $0x28] sm:$0xff] }
 0xf1a   :  { %3423 = vmatprep.subr.bf16.mxu0 %v3422_v49  ;;  %v2477_v49 = vld [vmem:[#allocation10 + $0x168] sm:$0xff] }
 0xf1c   :  { %3397 = vmatpush3.bf16.msra.mxu1 %v3394_v14  ;;  %v3424_v14 = vpack.c.bf16 %v2447_v10, %v2444_v9  ;;  %v2474_v9 = vld [vmem:[#allocation10 + $0x150] sm:$0xff] }
 0xf1d   :  { %3399 = vmatprep.subr.bf16.mxu1 %v3398_v18  ;;  %v3444_v11 = vpack.c.bf16 %v2477_v49, %v2474_v9  ;;  %v2680_v9 = vld [vmem:[#allocation11 + $0xc8] sm:$0xff]  ;;  %v2695_v49 = vld [vmem:[#allocation11 + $0x140] sm:$0xff] }
 0xf1e   :  { %3425 = vmatpush1.bf16.msra.mxu0 %v3424_v14 }
 0xf20   :  { %3401 = vmatpush3.bf16.msra.mxu1 %v3398_v18 }
 0xf21   :  { %3403 = vmatprep.subr.bf16.mxu1 %v3402_v6 }
 0xf24   :  { %3405 = vmatpush3.bf16.msra.mxu1 %v3402_v6 }
 0xf25   :  { %3407 = vmatprep.subr.bf16.mxu1 %v3406_v23 }
 0xf28   :  { %3409 = vmatpush3.bf16.msra.mxu1 %v3406_v23 }
 0xf29   :  { %3411 = vmatprep.subr.bf16.mxu1 %v3410_v51 }
 0xf2c   :  { %3413 = vmatpush3.bf16.msra.mxu1 %v3410_v51  ;;  %v2454_v51 = vld [vmem:[#allocation10 + $0xb0] sm:$0xff] }
 0xf2d   :  { %3447 = vmatprep.subr.bf16.mxu1 %v3446_v52 }
 0xfe2   :  { %v2216_v40 = vpop.f32.mrb[18].mxu1 }
 0xfe3   :  { %v2293_v55 = vmul.f32 %v4167_v20, %v2216_v40  ;;  %v3207_v25 = vpop.f32.mrb[19].mxu1  ;;  %v3426_v40 = vpack.c.bf16 %v2454_v51, %v2451_v2  ;;  %v2422_v51 = vsub.s32 2, %v3946_v35 }
 0xfe4   :  { %v2453_v25 = vld [vmem:[#allocation10 + $0xa8] sm:$0xff] }
 0xfe5   :  { %v2295_v27 = vadd.f32 %v2293_v55, %v4190_v56  ;;  %v3613_v56 = vld [vmem:[#allocation2] sm:$0xff]  ;;  %v2450_v55 = vld [vmem:[#allocation10 + $0x90] sm:$0xff]  ;;  %3427 = vmatprep.subr.bf16.mxu0 %v3426_v40  ;;  %v2428_v40 = vsub.s32 3, %v3946_v35 }
 0xfe6   :  { %v2289_v28 = vpop.f32.mrb[32].mxu0 }
 0xfe7   :  { %v2294_v29 = vmul.f32 %v4167_v20, %v2289_v28  ;;  %v3212_v30 = vpop.f32.mrb[33].mxu0  ;;  %3245 = vmatprep.mubr.f32.mxu1 %v2295_v27  ;;  %v2452_v27 = vld [vmem:[#allocation10 + $0xa0] sm:$0xff]  ;;  %v3428_v28 = vpack.c.bf16 %v2453_v25, %v2450_v55  ;;  %v4232_v55 = vld [vmem:[#allocation5] sm:$0xff] }
 0xfe8   :  { %v2423_v25 = vrot.slane %v4232_v55, %v2422_v51 }
 0xfe9   :  { %v2296_v32 = vadd.f32 %v2294_v29, %v4193_v33  ;;  %v2455_v29 = vld [vmem:[#allocation10 + $0xb8] sm:$0xff]  ;;  %3429 = vmatpush1.bf16.msra.mxu0 %v3428_v28 }
 0xfea   :  { %v3458_v30 = vpack.c.bf16 %v2455_v29, %v2452_v27 }
 0xfeb   :  { %3246 = vmatmul.mubr.f32.vlgmr.msra.gmra.mrb[20].mxu1 %v2296_v32  ;;  %v2460_v32 = vld [vmem:[#allocation10 + $0xe0] sm:$0xff] }
 0xfec   :  { %3449 = vmatpush3.bf16.msra.mxu1 %v3446_v52  ;;  %v3438_v52 = vpack.c.bf16 %v2472_v48, %v2469_v47  ;;  %v2692_v47 = vld [vmem:[#allocation11 + $0x128] sm:$0xff]  ;;  %v3484_v48 = vpack.c.bf16 %v2658_v0, %v2657_v39 }
 0xfed   :  { %3451 = vmatprep.subr.bf16.mxu1 %v3450_v7  ;;  %v3518_v57 = vpack.c.bf16 %v2692_v47, %v2691_v46  ;;  %v2480_v0 = vld [vmem:[%s4271_s2] sm:$0x7]  ;;  %s3792_s2 = smov [#allocation13]  }
 0xfee   :  { %s2866_s27 = sshll.u32 %s3792_s2, 4  ;;  %s2867_s27 = int_to_ptr.vmem [resolvable:$true] %s2866_s27 }
 0xfef   :  { %s3747_s28 = scalar_lea.vmem %s2867_s27, 256  ;;  %p3752_p7 = scmp.lt.s32.totalorder %s2867_s27, %s2867_s27 }
 0xff0   :  { %3453 = vmatpush3.bf16.msra.mxu1 %v3450_v7  ;;  %v2476_v7 = vld [vmem:[#allocation10 + $0x160] sm:$0xff]  ;;  %p3748_p6 = scmp.ne.s32.totalorder %s2867_s27, %s3747_s28  ;;  %p3753_p8 = scmp.lt.s32.totalorder %s3747_s28, %s3747_s28 }
 0xff1   :  { %3455 = vmatprep.subr.bf16.mxu1 %v3454_v13  ;;  %v3474_v10 = vpack.c.bf16 %v2479_v8, %v2476_v7  ;;  %v2662_v7 = vld [vmem:[#allocation11 + $0x38] sm:$0xff]  ;;  %v3522_v8 = vpack.c.bf16 %v2694_v62, %v2693_v61 }
 0xff2   :  { %p3754_p9 = por %p3753_p8, %p3752_p7 }
 0xff4   :  { %3457 = vmatpush3.bf16.msra.mxu1 %v3454_v13  ;;  %v2672_v13 = vld [vmem:[#allocation11 + $0x88] sm:$0xff]  ;;  %p3755_p10 = pnand %p3754_p9, %p3748_p6 }
 0xff5   :  { %3459 = vmatprep.subr.bf16.mxu1 %v3458_v30  ;;  %v3478_v14 = vpack.c.bf16 %v2672_v13, %v2671_v12  ;;  %v2663_v13 = vld [vmem:[#allocation11 + $0x40] sm:$0xff] }
 0xff8   :  { %3461 = vmatpush3.bf16.msra.mxu1 %v3458_v30 }
0x10be   :  { %v3247_v37 = vpop.f32.mrb[20].mxu1 }
0x10bf   :  { %v2389_v26 = vadd.f32 %v3247_v37, %v2316_v54  ;;  %v2383_v31 = vpop.f32.mrb[21].mxu1  ;;  %v2459_v37 = vld [vmem:[#allocation10 + $0xd8] sm:$0xff] }
0x10c0   :  { %v2384_v36 = vadd.f32 %v2383_v31, %v2316_v54  ;;  %v2456_v54 = vld [vmem:[#allocation10 + $0xc0] sm:$0xff] }
0x10c1   :  { %v4210_v43 = vadd.f32 %v3612_v42, %v2389_v26  ;;  %v2458_v26 = vld [vmem:[#allocation10 + $0xd0] sm:$0xff]  ;;  %v3432_v31 = vpack.c.bf16 %v2459_v37, %v2456_v54  ;;  %v2463_v42 = vld [vmem:[#allocation10 + $0xf8] sm:$0xff]  ;;  %v2656_v54 = vld [vmem:[#allocation11 + $0x8] sm:$0xff] }
0x10c2   :  { %v4212_v34 = vadd.f32 %v3613_v56, %v2384_v36  ;;  %v2461_v36 = vld [vmem:[#allocation10 + $0xe8] sm:$0xff]  ;;  %v2466_v56 = vld [vmem:[#allocation10 + $0x110] sm:$0xff] }
0x10c3   :  { %v2395_v20 = vmul.f32 %v3929_v3, %v4210_v43  ;;  %v2673_v37 = vld [vmem:[#allocation11 + $0x90] sm:$0xff] }
0x10c4   :  { %v2394_v33 = vmul.f32 %v3929_v3, %v4212_v34 }
0x10c5   :  { %2398 = vadd.xlane.f32.xlu1 %v2395_v20  ;;  %v3462_v20 = vpack.c.bf16 %v2461_v36, %v2458_v26  ;;  %v2689_v36 = vld [vmem:[#allocation11 + $0x110] sm:$0xff] }
0x10c6   :  { %2396 = vadd.xlane.f32.xlu0 %v2394_v33  ;;  %v3434_v33 = vpack.c.bf16 %v2466_v56, %v2463_v42  ;;  %v2690_v42 = vld [vmem:[#allocation11 + $0x118] sm:$0xff] }
0x10c7   :  { %3463 = vmatprep.subr.bf16.mxu1 %v3462_v20 }
0x10c8   :  { %3465 = vmatpush3.bf16.msra.mxu1 %v3462_v20 }
0x10c9   :  { %3467 = vmatprep.subr.bf16.mxu1 %v3466_v50 }
0x10cc   :  { %3469 = vmatpush3.bf16.msra.mxu1 %v3466_v50 }
0x10cd   :  { %3471 = vmatprep.subr.bf16.mxu1 %v3470_v63 }
0x10d0   :  { %3473 = vmatpush3.bf16.msra.mxu1 %v3470_v63 }
0x10d1   :  { %3475 = vmatprep.subr.bf16.mxu1 %v3474_v10 }
0x10d4   :  { %3477 = vmatpush3.bf16.msra.mxu1 %v3474_v10  ;;  %v2696_v10 = vld [vmem:[#allocation11 + $0x148] sm:$0xff] }
0x1152   :  { %v2399_v15 = vpop.xlane.xlu1 %2398 }
0x1153   :  { %v2401_v16 = vmul.f32 0.011111111, %v2399_v15  ;;  %v2397_v18 = vpop.xlane.xlu0 %2396  ;;  %v2687_v15 = vld [vmem:[#allocation11 + $0x100] sm:$0xff] }
0x1154   :  { %v2400_v19 = vmul.f32 0.011111111, %v2397_v18 }
0x1155   :  { %v2403_v17 = vsub.f32 %v4210_v43, %v2401_v16  ;;  %v2688_v16 = vld [vmem:[#allocation11 + $0x108] sm:$0xff] }
0x1156   :  { %v2402_v6 = vsub.f32 %v4212_v34, %v2400_v19  ;;  %v3510_v18 = vpack.c.bf16 %v2688_v16, %v2687_v15  ;;  %v3526_v15 = vpack.c.bf16 %v2696_v10, %v2695_v49  ;;  %v2681_v16 = vld [vmem:[#allocation11 + $0xd0] sm:$0xff] }
0x1157   :  { %v4221_v21 = vmul.f32 %v3929_v3, %v2403_v17 }
0x1158   :  { %v4224_v22 = vmul.f32 %v3929_v3, %v2402_v6  ;;  %v2457_v3 = vld [vmem:[#allocation10 + $0xc8] sm:$0xff]  ;;  %3511 = vmatprep.subr.bf16.mxu1 %v3510_v18 }
0x1159   :  { %v2407_v23 = vmul.f32 %v4221_v21, %v4221_v21  ;;  %v3430_v53 = vpack.c.bf16 %v2460_v32, %v2457_v3  ;;  %v2429_v3 = vrot.slane %v4232_v55, %v2428_v40 }
0x115a   :  { %v2406_v24 = vmul.f32 %v4224_v22, %v4224_v22 }
0x115b   :  { %2410 = vadd.xlane.f32.xlu1 %v2407_v23  ;;  %3431 = vmatprep.subr.bf16.mxu0 %v3430_v53  ;;  %v2655_v53 = vld [vmem:[#allocation11] sm:$0xff] }
0x115c   :  { %2408 = vadd.xlane.f32.xlu0 %v2406_v24  ;;  %3433 = vmatpush1.bf16.msra.mxu0 %v3432_v31  ;;  %v2674_v31 = vld [vmem:[#allocation11 + $0x98] sm:$0xff]  ;;  %v3480_v20 = vpack.c.bf16 %v2656_v54, %v2655_v53  ;;  %v2700_v54 = vld [vmem:[#allocation11 + $0x168] sm:$0xff] }
0x115d   :  { %3435 = vmatprep.subr.bf16.mxu0 %v3434_v33  ;;  %v3482_v44 = vpack.c.bf16 %v2674_v31, %v2673_v37  ;;  %v2686_v31 = vld [vmem:[#allocation11 + $0xf8] sm:$0xff] }
0x1160   :  { %3437 = vmatpush1.bf16.msra.mxu0 %v3436_v45  ;;  %v3514_v45 = vpack.c.bf16 %v2690_v42, %v2689_v36  ;;  %v2669_v42 = vld [vmem:[#allocation11 + $0x70] sm:$0xff] }
0x1161   :  { %3439 = vmatprep.subr.bf16.mxu0 %v3438_v52  ;;  %v2659_v52 = vld [vmem:[#allocation11 + $0x20] sm:$0xff] }
0x1162   :  { %v3488_v63 = vpack.c.bf16 %v2660_v60, %v2659_v52 }
0x1164   :  { %3441 = vmatpush1.bf16.msra.mxu0 %v3440_v4  ;;  %v2661_v4 = vld [vmem:[#allocation11 + $0x30] sm:$0xff] }
0x1165   :  { %3443 = vmatprep.subr.bf16.mxu0 %v3442_v5  ;;  %v2679_v5 = vld [vmem:[#allocation11 + $0xc0] sm:$0xff] }
0x1166   :  { %v3494_v12 = vpack.c.bf16 %v2680_v9, %v2679_v5 }
0x1168   :  { %3445 = vmatpush1.bf16.msra.mxu0 %v3444_v11  ;;  %v3492_v11 = vpack.c.bf16 %v2662_v7, %v2661_v4 }
0x1169   :  { %3479 = vmatprep.subr.bf16.mxu0 %v3478_v14  ;;  %v2664_v14 = vld [vmem:[#allocation11 + $0x48] sm:$0xff] }
0x11e8   :  { %v2411_v19 = vpop.xlane.xlu1 %2410 }
0x11e9   :  { %v2413_v17 = vmul.f32 0.011111111, %v2411_v19  ;;  %v2409_v6 = vpop.xlane.xlu0 %2408  ;;  %v2697_v19 = vld [vmem:[#allocation11 + $0x150] sm:$0xff] }
0x11ea   :  { %v2412_v23 = vmul.f32 0.011111111, %v2409_v6  ;;  %v3496_v6 = vpack.c.bf16 %v2664_v14, %v2663_v13 }
0x11eb   :  { %v2415_v24 = vadd.f32 1e-05, %v2413_v17  ;;  %v2698_v17 = vld [vmem:[#allocation11 + $0x158] sm:$0xff] }
0x11ec   :  { %v2414_v2 = vadd.f32 1e-05, %v2412_v23  ;;  %v3530_v40 = vpack.c.bf16 %v2698_v17, %v2697_v19 }
0x11ed   :  { %3608 = vrsqrt.f32 %v2415_v24  ;;  %v2665_v24 = vld [vmem:[#allocation11 + $0x50] sm:$0xff] }
0x11ee   :  { %3610 = vrsqrt.f32 %v2414_v2  ;;  %v2666_v2 = vld [vmem:[#allocation11 + $0x58] sm:$0xff] }
0x11f7   :  { %v3609_v27 = vpop.eup %3608 }
0x11f8   :  { %v3611_v28 = vpop.eup %3610  ;;  %v2419_v29 = vmul.f32 %v3609_v27, %v4221_v21  ;;  %v2675_v21 = vld [vmem:[#allocation11 + $0xa0] sm:$0xff]  ;;  %v2684_v27 = vld [vmem:[#allocation11 + $0xe8] sm:$0xff] }
0x11f9   :  { %v2418_v30 = vmul.f32 %v3611_v28, %v4224_v22  ;;  %v2676_v22 = vld [vmem:[#allocation11 + $0xa8] sm:$0xff]  ;;  %v3500_v28 = vpack.c.bf16 %v2666_v2, %v2665_v24 }
0x11fa   :  { %v2425_v32 = vmul.f32 %v2423_v25, %v2419_v29  ;;  %v3486_v50 = vpack.c.bf16 %v2676_v22, %v2675_v21  ;;  %v2489_v21 = vrot.slane %v2480_v0, %v149_v41  ;;  %v2493_v22 = vrot.slane %v2480_v0, %v2422_v51 }
0x11fb   :  { %v2424_v26 = vmul.f32 %v2423_v25, %v2418_v30  ;;  %v2683_v25 = vld [vmem:[#allocation11 + $0xe0] sm:$0xff] }
0x11fc   :  { %v2431_v33 = vadd.f32 %v2429_v3, %v2425_v32  ;;  %v3502_v29 = vpack.c.bf16 %v2684_v27, %v2683_v25  ;;  %v2667_v30 = vld [vmem:[#allocation11 + $0x60] sm:$0xff] }
0x11fd   :  { %v2430_v56 = vadd.f32 %v2429_v3, %v2424_v26  ;;  %v2668_v3 = vld [vmem:[#allocation11 + $0x68] sm:$0xff]  ;;  %v2699_v32 = vld [vmem:[#allocation11 + $0x160] sm:$0xff]  ;;  %v2685_v26 = vld [vmem:[#allocation11 + $0xf0] sm:$0xff] }
0x11fe   :  { %v3504_v53 = vpack.c.bf16 %v2668_v3, %v2667_v30  ;;  %v3534_v37 = vpack.c.bf16 %v2700_v54, %v2699_v32  ;;  %v3506_v36 = vpack.c.bf16 %v2686_v31, %v2685_v26 }
0x11ff   :  { %2562 = vmatmul.mubr.f32.vlgmr.msra.gmra.mrb[34].mxu0 %v2430_v56  ;;  %3280 = vmatprep.mubr.f32.mxu1 %v2430_v56  ;;  %v2670_v56 = vld [vmem:[#allocation11 + $0x78] sm:$0xff] }
0x1200   :  { %3281 = vmatmul.mubr.f32.vlgmr.msra.gmra.mrb[22].mxu1 %v2431_v33  ;;  %2567 = vmatprep.mubr.f32.mxu0 %v3789_v1  ;;  %v3490_v1 = vpack.c.bf16 %v2678_v59, %v2677_v58 }
0x1201   :  { %3481 = vmatpush3.bf16.msra.mxu0 %v3480_v20  ;;  %3513 = vmatpush3.bf16.msra.mxu1 %v3510_v18  ;;  %v2682_v18 = vld [vmem:[#allocation11 + $0xd8] sm:$0xff]  ;;  %v2701_v20 = vld [vmem:[#allocation11 + $0x170] sm:$0xff] }
0x1202   :  { %3483 = vmatprep.subr.bf16.mxu0 %v3482_v44  ;;  %3515 = vmatprep.subr.bf16.mxu1 %v3514_v45  ;;  %v3498_v23 = vpack.c.bf16 %v2682_v18, %v2681_v16  ;;  %v2702_v44 = vld [vmem:[#allocation11 + $0x178] sm:$0xff] }
0x1203   :  { %2568 = vmatmul.mubr.f32.gmra.mrb[36].mxu0 %v2431_v33  ;;  %v3508_v33 = vpack.c.bf16 %v2670_v56, %v2669_v42  ;;  %v3538_v39 = vpack.c.bf16 %v2702_v44, %v2701_v20 }
0x1205   :  { %3485 = vmatpush3.bf16.msra.mxu0 %v3484_v48  ;;  %3517 = vmatpush3.bf16.msra.mxu1 %v3514_v45  ;;  %v2485_v45 = vrot.slane %v2480_v0, %v143_v38 }
0x1206   :  { %3487 = vmatprep.subr.bf16.mxu0 %v3486_v50  ;;  %3519 = vmatprep.subr.bf16.mxu1 %v3518_v57 }
0x1209   :  { %3489 = vmatpush3.bf16.msra.mxu0 %v3488_v63  ;;  %3521 = vmatpush3.bf16.msra.mxu1 %v3518_v57 }
0x120a   :  { %3491 = vmatprep.subr.bf16.mxu0 %v3490_v1  ;;  %3523 = vmatprep.subr.bf16.mxu1 %v3522_v8 }
0x120d   :  { %3493 = vmatpush3.bf16.msra.mxu0 %v3492_v11  ;;  %3525 = vmatpush3.bf16.msra.mxu1 %v3522_v8  ;;  %v2705_v8 = vsub.s32 5, %v3946_v35 }
0x120e   :  { %3495 = vmatprep.subr.bf16.mxu0 %v3494_v12  ;;  %3527 = vmatprep.subr.bf16.mxu1 %v3526_v15 }
0x120f   :  { %v2706_v9 = vrot.slane %v4232_v55, %v2705_v8 }
0x1211   :  { %3497 = vmatpush3.bf16.msra.mxu0 %v3496_v6  ;;  %3529 = vmatpush3.bf16.msra.mxu1 %v3526_v15 }
0x1212   :  { %3499 = vmatprep.subr.bf16.mxu0 %v3498_v23  ;;  %3531 = vmatprep.subr.bf16.mxu1 %v3530_v40 }
0x1215   :  { %3501 = vmatpush3.bf16.msra.mxu0 %v3500_v28  ;;  %3533 = vmatpush3.bf16.msra.mxu1 %v3530_v40 }
0x1216   :  { %3503 = vmatprep.subr.bf16.mxu0 %v3502_v29  ;;  %3535 = vmatprep.subr.bf16.mxu1 %v3534_v37 }
0x1219   :  { %3505 = vmatpush3.bf16.msra.mxu0 %v3504_v53  ;;  %3537 = vmatpush3.bf16.msra.mxu1 %v3534_v37 }
0x121a   :  { %3507 = vmatprep.subr.bf16.mxu0 %v3506_v36  ;;  %3539 = vmatprep.subr.bf16.mxu1 %v3538_v39 }
0x121d   :  { %3509 = vmatpush3.bf16.msra.mxu0 %v3508_v33  ;;  %3541 = vmatpush3.bf16.msra.mxu1 %v3538_v39 }
0x12d2   :  { %v2563_v46 = vpop.f32.mrb[34].mxu0 }
0x12d3   :  { %v2564_v47 = vadd.f32 %v2563_v46, %v2485_v45  ;;  %v2565_v48 = vpop.f32.mrb[35].mxu0  ;;  %v3282_v50 = vpop.f32.mrb[22].mxu1 }
0x12d4   :  { %v2566_v52 = vadd.f32 %v2565_v48, %v2489_v21  ;;  %v2646_v60 = vadd.f32 %v3282_v50, %v2493_v22  ;;  %v2640_v57 = vpop.f32.mrb[23].mxu1 }
0x12d5   :  { %v2641_v58 = vadd.f32 %v2640_v57, %v2493_v22  ;;  %v2649_v62 = vmax.f32 %v2564_v47, 0.0 }
0x12d6   :  { %v2650_v59 = vmax.f32 %v2566_v52, 0.0  ;;  %v2569_v61 = vpop.f32.mrb[36].mxu0  ;;  %v2654_v4 = vmax.f32 %v2646_v60, 0.0 }
0x12d7   :  { %v2651_v63 = vmax.f32 %v2641_v58, 0.0  ;;  %v2570_v1 = vadd.f32 %v2569_v61, %v2485_v45  ;;  %v2571_v38 = vpop.f32.mrb[37].mxu0 }
0x12d8   :  { %v2572_v7 = vadd.f32 %v2571_v38, %v2489_v21  ;;  %2771 = vmatprep.mubr.f32.mxu0 %v2650_v59 }
0x12d9   :  { %2772 = vmatmul.mubr.f32.vlgmr.msra.gmra.mrb[38].mxu0 %v2649_v62  ;;  %3315 = vmatprep.mubr.f32.mxu1 %v2651_v63  ;;  %v2652_v51 = vmax.f32 %v2570_v1, 0.0 }
0x12da   :  { %v2653_v41 = vmax.f32 %v2572_v7, 0.0  ;;  %3316 = vmatmul.mubr.f32.vlgmr.msra.gmra.mrb[24].mxu1 %v2654_v4 }
0x12dc   :  { %2776 = vmatprep.mubr.f32.mxu0 %v2653_v41 }
0x12dd   :  { %2777 = vmatmul.mubr.f32.gmra.mrb[40].mxu0 %v2652_v51 }
0x13ac   :  { %v3034_v5 = vpop.f32.mrb[38].mxu0 }
0x13ad   :  { %v3035_v49 = vpop.f32.mrb[39].mxu0  ;;  %v3317_v10 = vpop.f32.mrb[24].mxu1 }
0x13ae   :  { %v3036_v11 = vadd.f32 %v3035_v49, %v3034_v5  ;;  %v2848_v12 = vpop.f32.mrb[25].mxu1 }
0x13b0   :  { %v2774_v13 = vadd.f32 %v3036_v11, %v2706_v9  ;;  %v3037_v14 = vpop.f32.mrb[40].mxu0 }
0x13b1   :  { %v3038_v15 = vpop.f32.mrb[41].mxu0 }
0x13b2   :  { %v2849_v16 = vadd.f32 %v2848_v12, %v2774_v13  ;;  %v3039_v18 = vadd.f32 %v3038_v15, %v3037_v14 }
0x13b4   :  { %v2857_v19 = vadd.f32 %v2849_v16, %v4212_v34  ;;  %v2779_v17 = vadd.f32 %v3039_v18, %v2706_v9 }
0x13b6   :  { %2859 = vst [vmem:[#allocation13] sm:$0xff] %v2857_v19  ;;  %v2854_v6 = vadd.f32 %v3317_v10, %v2779_v17 }
0x13b8   :  { %v2858_v35 = vadd.f32 %v2854_v6, %v4210_v43 }
0x13ba   :  { %2860 = vst [vmem:[#allocation13 + $0x8] sm:$0xff] %v2858_v35 }
0x13bb   :  { %3758 = shalt.err (!%p3755_p10)
}
0x13bc   :  { %s3759_s8 = scalar_lea.hbm %s4276_s7, 256 }
0x13bd   :  { %p3760_p11 = scmp.ne.s32.totalorder %s4276_s7, %s3759_s8  ;;  %p3763_p12 = scmp.lt.u32.totalorder %s3759_s8, %s4276_s7 }
0x13bf   :  { %p3765_p13 = pnand %p3763_p12, %p3760_p11 }
0x13c1   :  { %3768 = shalt.err (!%p3765_p13)
}
0x13c2   :  { %2872 = dma.vmem_to_hbm [thread:$0]  %s2867_s27, 256, %s4276_s7, [#allocation4], %s3782_s24, %s3782_s24, %s3783_s25  }
0x13c3   :  { %3777 = dma.done.wait [#allocation4], 256  }
0x13c4   :  { %3778 = vsyncadd [#allocation4], 4294967040 }
0x13c5   :  { %2876 = vsyncpa [#allocation3], 1 }
0x13c6   :  { %2877 = vsyncpa [#allocation6], 1 }
0x13c7   :  { %2878 = vsyncpa [#allocation9], 1 }
0x13c8   :  { %2879 = vsyncpa [#allocation12], 1 }
0x13c9   :  { %2880 = vsyncpa [#allocation4], 1 }

</bundles_post_ra>
